<compile_context>
chip_gen: v5e
topology: v5e:2x2
jax: 0.10.0
libtpu: 0.0.40
codegen_flags: <defaults>
</compile_context>

<pallas_src>
import functools

import jax
import jax.numpy as jnp
from jax.experimental import pallas as pl
from jax.experimental.pallas import tpu as pltpu

_H1, _H2 = 400, 300          # logical hidden sizes (PyTorch module)
_H1P, _H2P = 512, 384        # zero-padded, lane/MXU friendly sizes


def _round_up(n, m):
    return ((n + m - 1) // m) * m


def _tpu_generation_info():
    """(num_tensorcores, max_batch_tile) from the attached TPU generation."""
    try:
        kind = jax.devices()[0].device_kind.lower()
    except Exception:
        kind = ""
    n_cores = 2 if "v7" in kind else 1            # v7x: 2 TCs per chip
    max_tb = 2048 if ("v7" in kind or "v6" in kind) else 1024
    return n_cores, max_tb


_N_CORES, _MAX_TB = _tpu_generation_info()


# ---------------------------------------------------------------------------
# Fused twin-Q kernel: both heads, all three layers, one batch tile per step.
# ---------------------------------------------------------------------------
def _critic_kernel(xa_ref, w1_ref, b1_ref, w2_ref, b2_ref, w3_ref, b3_ref,
                   q_ref):
    xa = xa_ref[...]                                       # [TB, Din] bf16

    # Layer 1: both heads fused along the output axis (N = 2*_H1P), single
    # MXU push sequence over the concatenated [x, a] input.
    h1 = jnp.dot(xa, w1_ref[...], preferred_element_type=jnp.float32)
    h1 = jnp.maximum(h1 + b1_ref[...], 0.0)                # [TB, 2*_H1P] f32
    h1 = h1.astype(jnp.bfloat16)

    # Layer 2: per head (lane slice at 512 is tile-aligned).
    h2a = jnp.dot(h1[:, :_H1P], w2_ref[0], preferred_element_type=jnp.float32)
    h2a = jnp.maximum(h2a + b2_ref[0], 0.0).astype(jnp.bfloat16)   # [TB, 384]
    h2b = jnp.dot(h1[:, _H1P:], w2_ref[1], preferred_element_type=jnp.float32)
    h2b = jnp.maximum(h2b + b2_ref[1], 0.0).astype(jnp.bfloat16)   # [TB, 384]

    # Layer 3: each head's w3 lives in its own output column of a [H2P, 2]
    # matrix, so both heads land in one lane-dense [TB, 2] store.
    q = jnp.dot(h2a, w3_ref[0], preferred_element_type=jnp.float32)
    q = q + jnp.dot(h2b, w3_ref[1], preferred_element_type=jnp.float32)
    q_ref[...] = q + b3_ref[...]                           # [TB, 2] f32


# ---------------------------------------------------------------------------
# Parameter construction (mimics nn.Linear default init:
# U(-1/sqrt(fan_in), 1/sqrt(fan_in)) for weight and bias).
# ---------------------------------------------------------------------------
def init_linear(key, fan_in, fan_out):
    kw, kb = jax.random.split(key)
    bound = 1.0 / float(fan_in) ** 0.5
    w = jax.random.uniform(kw, (fan_in, fan_out), jnp.float32, -bound, bound)
    b = jax.random.uniform(kb, (fan_out,), jnp.float32, -bound, bound)
    return w, b


def init_critic_params(key, d_obs, d_act):
    din = d_obs + d_act
    keys = jax.random.split(key, 6)
    heads = []
    for h in range(2):
        w1, b1 = init_linear(keys[3 * h + 0], din, _H1)
        w2, b2 = init_linear(keys[3 * h + 1], _H1, _H2)
        w3, b3 = init_linear(keys[3 * h + 2], _H2, 1)
        heads.append((w1, b1, w2, b2, w3, b3))
    raw = {"q1": heads[0], "q2": heads[1]}
    packed = pack_critic_params(raw, d_obs, d_act)
    return raw, packed


def pack_critic_params(raw, d_obs, d_act):
    """Zero-pad to lane-friendly sizes and pack both heads for the kernel."""
    din = d_obs + d_act
    w1_l, b1_l, w2_l, b2_l, w3_l, b3_l = [], [], [], [], [], []
    for h, name in enumerate(("q1", "q2")):
        w1, b1, w2, b2, w3, b3 = raw[name]
        w1_l.append(jnp.zeros((din, _H1P), jnp.float32).at[:, :_H1].set(w1))
        b1_l.append(jnp.zeros((_H1P,), jnp.float32).at[:_H1].set(b1))
        w2_l.append(jnp.zeros((_H1P, _H2P), jnp.float32)
                    .at[:_H1, :_H2].set(w2))
        b2_l.append(jnp.zeros((1, _H2P), jnp.float32).at[0, :_H2].set(b2))
        # Head h's w3 goes into output column h of a [H2P, 2] matrix.
        w3_l.append(jnp.zeros((_H2P, 2), jnp.float32)
                    .at[:_H2, h:h + 1].set(w3))
        b3_l.append(b3)
    return {
        # TODO(synk): optional fp8 w2 on v7x (accuracy trade-off) not applied.
        "w1": jnp.concatenate(w1_l, axis=1).astype(jnp.bfloat16),   # [Din, 1024]
        "b1": jnp.concatenate(b1_l).reshape(1, 2 * _H1P),           # f32 [1, 1024]
        "w2": jnp.stack(w2_l).astype(jnp.bfloat16),                 # [2, 512, 384]
        "b2": jnp.stack(b2_l),                                      # f32 [2, 1, 384]
        "w3": jnp.stack(w3_l).astype(jnp.bfloat16),                 # [2, 384, 2]
        "b3": jnp.concatenate(b3_l).reshape(1, 2),                  # f32 [1, 2]
    }


# ---------------------------------------------------------------------------
# Forward pass: one fused pallas_call over a batch-tiled grid.
# ---------------------------------------------------------------------------
@functools.partial(jax.jit, static_argnames=())
def critic_forward(packed, x, action):
    B, d_obs = x.shape
    d_act = action.shape[1]
    din = d_obs + d_act

    b8 = _round_up(B, 8)
    if b8 <= _MAX_TB * _N_CORES:
        # Small/medium batch: one resident tile per TensorCore (v7x gets two
        # grid steps so dimension_semantics=("parallel",) uses both cores).
        n_tiles = max(1, min(_N_CORES, b8 // 8))
        tb = _round_up(-(-b8 // n_tiles), 8)
        bp = tb * n_tiles
    else:
        tb = _MAX_TB                         # pipelined, double-buffered tiles
        bp = _round_up(B, tb)

    # Single concatenated bf16 input: the only per-step streamed array.  The
    # zero-pad copy is skipped entirely when B already matches bp.
    if bp != B:
        xa = (jnp.zeros((bp, din), jnp.bfloat16)
              .at[:B, :d_obs].set(x.astype(jnp.bfloat16))
              .at[:B, d_obs:].set(action.astype(jnp.bfloat16)))
    else:
        xa = jnp.concatenate([x, action], axis=-1).astype(jnp.bfloat16)

    const2 = lambda i: (0, 0)
    const3 = lambda i: (0, 0, 0)

    # Generous explicit VMEM budget so large batch tiles never hit the default
    # scoped limit (16 MiB on v5e); stays well inside v7x's 64 MiB physical.
    vmem_limit = (48 << 20) if tb > 1024 else (32 << 20)

    q = pl.pallas_call(
        _critic_kernel,
        out_shape=jax.ShapeDtypeStruct((bp, 2), jnp.float32),
        grid=(bp // tb,),
        in_specs=[
            pl.BlockSpec((tb, din), lambda i: (i, 0)),
            pl.BlockSpec(packed["w1"].shape, const2),
            pl.BlockSpec(packed["b1"].shape, const2),
            pl.BlockSpec(packed["w2"].shape, const3),
            pl.BlockSpec(packed["b2"].shape, const3),
            pl.BlockSpec(packed["w3"].shape, const3),
            pl.BlockSpec(packed["b3"].shape, const2),
        ],
        out_specs=pl.BlockSpec((tb, 2), lambda i: (i, 0)),
        compiler_params=pltpu.CompilerParams(
            dimension_semantics=("parallel",),
            vmem_limit_bytes=vmem_limit),
    )(xa, packed["w1"], packed["b1"], packed["w2"], packed["b2"],
      packed["w3"], packed["b3"])

    q = q[:B]
    return q[:, 0:1], q[:, 1:2]


# Pure-JAX reference (f32 master weights) for a correctness sanity check.
def critic_forward_ref(raw, x, action):
    xa = jnp.concatenate([x, action], axis=-1).astype(jnp.float32)

    def head(p):
        w1, b1, w2, b2, w3, b3 = p
        h = jnp.maximum(xa @ w1 + b1, 0.0)
        h = jnp.maximum(h @ w2 + b2, 0.0)
        return h @ w3 + b3

    return head(raw["q1"]), head(raw["q2"])


if __name__ == "__main__":
    key = jax.random.PRNGKey(0)
    k_obs, k_act, k_params = jax.random.split(key, 3)

    B, D_OBS, D_ACT = 2, 16, 8              # small synthetic env dims
    x = jax.random.normal(k_obs, (B, D_OBS), jnp.float32)
    action = jax.random.normal(k_act, (B, D_ACT), jnp.float32)

    raw, packed = init_critic_params(k_params, D_OBS, D_ACT)

    q1, q2 = critic_forward(packed, x, action)
    jax.block_until_ready((q1, q2))

    r1, r2 = critic_forward_ref(raw, x, action)
    assert q1.shape == (B, 1) and q2.shape == (B, 1)
    # bf16 weights/activations in the kernel -> loosened tolerances.
    assert jnp.allclose(q1, r1, atol=2e-2, rtol=2e-2)
    assert jnp.allclose(q2, r2, atol=2e-2, rtol=2e-2)

    print("KERNEL_OK")
</pallas_src>

<mosaic_0001>
module attributes {stable_mosaic.version = 11 : i64} {
  func.func @_critic_kernel(%arg0: i32, %arg1: memref<8x24xbf16, #tpu.memory_space<vmem>>, %arg2: memref<24x1024xbf16, #tpu.memory_space<vmem>>, %arg3: memref<1x1024xf32, #tpu.memory_space<vmem>>, %arg4: memref<2x512x384xbf16, #tpu.memory_space<vmem>>, %arg5: memref<2x1x384xf32, #tpu.memory_space<vmem>>, %arg6: memref<2x384x2xbf16, #tpu.memory_space<vmem>>, %arg7: memref<1x2xf32, #tpu.memory_space<vmem>>, %arg8: memref<8x2xf32, #tpu.memory_space<vmem>>) attributes {dimension_semantics = [#tpu.dimension_semantics<parallel>], iteration_bounds = array<i64: 1>, scalar_prefetch = 0 : i64, scratch_operands = 0 : i64, tpu.core_type = #tpu.core_type<tc>, window_params = [{transform_indices = @transform_0, window_bounds = array<i64: 8, 24>}, {pipeline_mode = #tpu.pipeline_mode<synchronous>, transform_indices = @transform_1, window_bounds = array<i64: 24, 1024>}, {pipeline_mode = #tpu.pipeline_mode<synchronous>, transform_indices = @transform_2, window_bounds = array<i64: 1, 1024>}, {pipeline_mode = #tpu.pipeline_mode<synchronous>, transform_indices = @transform_3, window_bounds = array<i64: 2, 512, 384>}, {pipeline_mode = #tpu.pipeline_mode<synchronous>, transform_indices = @transform_4, window_bounds = array<i64: 2, 1, 384>}, {pipeline_mode = #tpu.pipeline_mode<synchronous>, transform_indices = @transform_5, window_bounds = array<i64: 2, 384, 2>}, {pipeline_mode = #tpu.pipeline_mode<synchronous>, transform_indices = @transform_6, window_bounds = array<i64: 1, 2>}, {transform_indices = @transform_7, window_bounds = array<i64: 8, 2>}]} {
    %c0 = arith.constant 0 : index
    %c0_0 = arith.constant 0 : index
    %0 = vector.load %arg1[%c0, %c0_0] : memref<8x24xbf16, #tpu.memory_space<vmem>>, vector<8x24xbf16>
    %c0_1 = arith.constant 0 : index
    %c0_2 = arith.constant 0 : index
    %1 = vector.load %arg2[%c0_1, %c0_2] : memref<24x1024xbf16, #tpu.memory_space<vmem>>, vector<24x1024xbf16>
    %cst = arith.constant dense<0.000000e+00> : vector<8x1024xf32>
    %2 = tpu.matmul %0, %1, %cst {dimension_numbers = #tpu.dot_dimension_numbers<[1], [0], [0], [1], [0, 0, 1, 1], [], []>} : vector<8x24xbf16>, vector<24x1024xbf16>, vector<8x1024xf32> -> vector<8x1024xf32>
    %c0_3 = arith.constant 0 : index
    %c0_4 = arith.constant 0 : index
    %3 = vector.load %arg3[%c0_3, %c0_4] : memref<1x1024xf32, #tpu.memory_space<vmem>>, vector<1x1024xf32>
    %4 = vector.broadcast %3 : vector<1x1024xf32> to vector<8x1024xf32>
    %5 = arith.addf %2, %4 : vector<8x1024xf32>
    %cst_5 = arith.constant 0.000000e+00 : f32
    %6 = vector.broadcast %cst_5 : f32 to vector<8x1024xf32>
    %7 = arith.maximumf %5, %6 : vector<8x1024xf32>
    %8 = arith.truncf %7 : vector<8x1024xf32> to vector<8x1024xbf16>
    %9 = vector.extract_strided_slice %8 {offsets = [0, 0], sizes = [8, 512], strides = [1, 1]} : vector<8x1024xbf16> to vector<8x512xbf16>
    %c0_6 = arith.constant 0 : index
    %c0_7 = arith.constant 0 : index
    %c0_8 = arith.constant 0 : index
    %10 = vector.load %arg4[%c0_6, %c0_7, %c0_8] : memref<2x512x384xbf16, #tpu.memory_space<vmem>>, vector<1x512x384xbf16>
    %11 = vector.shape_cast %10 : vector<1x512x384xbf16> to vector<512x384xbf16>
    %cst_9 = arith.constant dense<0.000000e+00> : vector<8x384xf32>
    %12 = tpu.matmul %9, %11, %cst_9 {dimension_numbers = #tpu.dot_dimension_numbers<[1], [0], [0], [1], [0, 0, 1, 1], [], []>} : vector<8x512xbf16>, vector<512x384xbf16>, vector<8x384xf32> -> vector<8x384xf32>
    %c0_10 = arith.constant 0 : index
    %c0_11 = arith.constant 0 : index
    %c0_12 = arith.constant 0 : index
    %13 = vector.load %arg5[%c0_10, %c0_11, %c0_12] : memref<2x1x384xf32, #tpu.memory_space<vmem>>, vector<1x1x384xf32>
    %14 = vector.shape_cast %13 : vector<1x1x384xf32> to vector<1x384xf32>
    %15 = vector.broadcast %14 : vector<1x384xf32> to vector<8x384xf32>
    %16 = arith.addf %12, %15 : vector<8x384xf32>
    %cst_13 = arith.constant 0.000000e+00 : f32
    %17 = vector.broadcast %cst_13 : f32 to vector<8x384xf32>
    %18 = arith.maximumf %16, %17 : vector<8x384xf32>
    %19 = arith.truncf %18 : vector<8x384xf32> to vector<8x384xbf16>
    %20 = vector.extract_strided_slice %8 {offsets = [0, 512], sizes = [8, 512], strides = [1, 1]} : vector<8x1024xbf16> to vector<8x512xbf16>
    %c1 = arith.constant 1 : index
    %c0_14 = arith.constant 0 : index
    %c0_15 = arith.constant 0 : index
    %21 = vector.load %arg4[%c1, %c0_14, %c0_15] : memref<2x512x384xbf16, #tpu.memory_space<vmem>>, vector<1x512x384xbf16>
    %22 = vector.shape_cast %21 : vector<1x512x384xbf16> to vector<512x384xbf16>
    %cst_16 = arith.constant dense<0.000000e+00> : vector<8x384xf32>
    %23 = tpu.matmul %20, %22, %cst_16 {dimension_numbers = #tpu.dot_dimension_numbers<[1], [0], [0], [1], [0, 0, 1, 1], [], []>} : vector<8x512xbf16>, vector<512x384xbf16>, vector<8x384xf32> -> vector<8x384xf32>
    %c1_17 = arith.constant 1 : index
    %c0_18 = arith.constant 0 : index
    %c0_19 = arith.constant 0 : index
    %24 = vector.load %arg5[%c1_17, %c0_18, %c0_19] : memref<2x1x384xf32, #tpu.memory_space<vmem>>, vector<1x1x384xf32>
    %25 = vector.shape_cast %24 : vector<1x1x384xf32> to vector<1x384xf32>
    %26 = vector.broadcast %25 : vector<1x384xf32> to vector<8x384xf32>
    %27 = arith.addf %23, %26 : vector<8x384xf32>
    %cst_20 = arith.constant 0.000000e+00 : f32
    %28 = vector.broadcast %cst_20 : f32 to vector<8x384xf32>
    %29 = arith.maximumf %27, %28 : vector<8x384xf32>
    %30 = arith.truncf %29 : vector<8x384xf32> to vector<8x384xbf16>
    %c0_21 = arith.constant 0 : index
    %c0_22 = arith.constant 0 : index
    %c0_23 = arith.constant 0 : index
    %31 = vector.load %arg6[%c0_21, %c0_22, %c0_23] : memref<2x384x2xbf16, #tpu.memory_space<vmem>>, vector<1x384x2xbf16>
    %32 = vector.shape_cast %31 : vector<1x384x2xbf16> to vector<384x2xbf16>
    %cst_24 = arith.constant dense<0.000000e+00> : vector<8x2xf32>
    %33 = tpu.matmul %19, %32, %cst_24 {dimension_numbers = #tpu.dot_dimension_numbers<[1], [0], [0], [1], [0, 0, 1, 1], [], []>} : vector<8x384xbf16>, vector<384x2xbf16>, vector<8x2xf32> -> vector<8x2xf32>
    %c1_25 = arith.constant 1 : index
    %c0_26 = arith.constant 0 : index
    %c0_27 = arith.constant 0 : index
    %34 = vector.load %arg6[%c1_25, %c0_26, %c0_27] : memref<2x384x2xbf16, #tpu.memory_space<vmem>>, vector<1x384x2xbf16>
    %35 = vector.shape_cast %34 : vector<1x384x2xbf16> to vector<384x2xbf16>
    %cst_28 = arith.constant dense<0.000000e+00> : vector<8x2xf32>
    %36 = tpu.matmul %30, %35, %cst_28 {dimension_numbers = #tpu.dot_dimension_numbers<[1], [0], [0], [1], [0, 0, 1, 1], [], []>} : vector<8x384xbf16>, vector<384x2xbf16>, vector<8x2xf32> -> vector<8x2xf32>
    %37 = arith.addf %33, %36 : vector<8x2xf32>
    %c0_29 = arith.constant 0 : index
    %c0_30 = arith.constant 0 : index
    %38 = vector.load %arg7[%c0_29, %c0_30] : memref<1x2xf32, #tpu.memory_space<vmem>>, vector<1x2xf32>
    %39 = vector.broadcast %38 : vector<1x2xf32> to vector<8x2xf32>
    %40 = arith.addf %37, %39 : vector<8x2xf32>
    %c0_31 = arith.constant 0 : index
    %c0_32 = arith.constant 0 : index
    %41 = vector.load %arg8[%c0_31, %c0_32] : memref<8x2xf32, #tpu.memory_space<vmem>>, vector<8x2xf32>
    tpu.vector_store %arg8[%c0_31, %c0_32], %40 {strides = array<i32>} : memref<8x2xf32, #tpu.memory_space<vmem>>, vector<8x2xf32>,
    return
  }
  func.func @transform_0(%arg0: i32) -> (i32, i32) {
    %c0_i32 = arith.constant 0 : i32
    %c0_i32_0 = arith.constant 0 : i32
    return %arg0, %c0_i32 : i32, i32
  }
  func.func @transform_1(%arg0: i32) -> (i32, i32) {
    %c0_i32 = arith.constant 0 : i32
    %c0_i32_0 = arith.constant 0 : i32
    %c0_i32_1 = arith.constant 0 : i32
    return %c0_i32, %c0_i32_0 : i32, i32
  }
  func.func @transform_2(%arg0: i32) -> (i32, i32) {
    %c0_i32 = arith.constant 0 : i32
    %c0_i32_0 = arith.constant 0 : i32
    %c0_i32_1 = arith.constant 0 : i32
    return %c0_i32, %c0_i32_0 : i32, i32
  }
  func.func @transform_3(%arg0: i32) -> (i32, i32, i32) {
    %c0_i32 = arith.constant 0 : i32
    %c0_i32_0 = arith.constant 0 : i32
    %c0_i32_1 = arith.constant 0 : i32
    %c0_i32_2 = arith.constant 0 : i32
    return %c0_i32, %c0_i32_0, %c0_i32_1 : i32, i32, i32
  }
  func.func @transform_4(%arg0: i32) -> (i32, i32, i32) {
    %c0_i32 = arith.constant 0 : i32
    %c0_i32_0 = arith.constant 0 : i32
    %c0_i32_1 = arith.constant 0 : i32
    %c0_i32_2 = arith.constant 0 : i32
    return %c0_i32, %c0_i32_0, %c0_i32_1 : i32, i32, i32
  }
  func.func @transform_5(%arg0: i32) -> (i32, i32, i32) {
    %c0_i32 = arith.constant 0 : i32
    %c0_i32_0 = arith.constant 0 : i32
    %c0_i32_1 = arith.constant 0 : i32
    %c0_i32_2 = arith.constant 0 : i32
    return %c0_i32, %c0_i32_0, %c0_i32_1 : i32, i32, i32
  }
  func.func @transform_6(%arg0: i32) -> (i32, i32) {
    %c0_i32 = arith.constant 0 : i32
    %c0_i32_0 = arith.constant 0 : i32
    %c0_i32_1 = arith.constant 0 : i32
    return %c0_i32, %c0_i32_0 : i32, i32
  }
  func.func @transform_7(%arg0: i32) -> (i32, i32) {
    %c0_i32 = arith.constant 0 : i32
    %c0_i32_0 = arith.constant 0 : i32
    return %arg0, %c0_i32 : i32, i32
  }
}

</mosaic_0001>

<bundles_post_ra>
// kernel: critic_forward.1
= control target key start
LH: loop header
LB: loop body
LE: loop exit
PB: predicated region body
PF: predicated region fallthrough
CT: control target
= control target key end

     0   :  { %12 = vsyncpa [#allocation3], 0  ;;  %s3731_s27 = smov [#allocation2]   ;;  %s3732_s29 = smov 192   ;;  %s4092_s0 = inlined_call_operand.vmem [shape: bf16[8,24], index: 0, kind: input, shape index: {}]   ;;  %s4093_s1 = inlined_call_operand.vmem [shape: bf16[24,1024], index: 1, kind: input, shape index: {}]   ;;  %s4094_s2 = inlined_call_operand.vmem [shape: f32[1,1024], index: 2, kind: input, shape index: {}]   ;;  %s4095_s3 = inlined_call_operand.hbm [shape: bf16[2,512,384], index: 3, kind: input, shape index: {}]   ;;  %s4096_s4 = inlined_call_operand.vmem [shape: f32[2,1,384], index: 4, kind: input, shape index: {}]   ;;  %s4097_s5 = inlined_call_operand.vmem [shape: bf16[2,384,2], index: 5, kind: input, shape index: {}]   ;;  %s4098_s6 = inlined_call_operand.vmem [shape: f32[1,2], index: 6, kind: input, shape index: {}]   ;;  %s4099_s7 = inlined_call_operand.vmem [shape: f32[8,2], index: 7, kind: output, shape index: {}]  }
   0x1   :  { %s23_s26 = sshll.u32 %s4095_s3, 4  ;;  %s25_s28 = sshll.u32 %s3731_s27, 4  ;;  %s24_s26 = int_to_ptr.hbm [resolvable:$true] %s23_s26  ;;  %s26_s28 = int_to_ptr.vmem [resolvable:$true] %s25_s28 }
   0x2   :  { %s3733_s30 = smov 12  }
   0x3   :  { %31 = dma.hbm_to_vmem [thread:$0]  %s24_s26, 24576, %s26_s28, [#allocation3], %s3732_s29, %s3732_s29, %s3733_s30  }
   0x4   :  { %3729 = dma.done.wait [#allocation3], 24576  }
   0x5   :  { %3730 = vsyncadd [#allocation3], 4294942720  ;;  %v52_v0 = vld [vmem:[%s4093_s1 + $0x40] sm:$0xff]  ;;  %vm138_vm0 = vcmask 1043456   ;;  %v53_v5 = vld [vmem:[%s4093_s1 + $0x48] sm:$0xff]  ;;  %vm134_vm1 = vcmask 195584  }
   0x6   :  { %v102_v1 = vunpack.c.l.b16 %v52_v0  ;;  %v103_v2 = vunpack.c.h.b16 %v52_v0  ;;  %v2406_v3 = vld [vmem:[%s4093_s1] sm:$0xf]  ;;  %v3453_v8 = vld [vmem:[%s4093_s1 + $0x4] sm:$0xf]  ;;  %v104_v10 = vunpack.c.l.b16 %v53_v5  ;;  %v105_v11 = vunpack.c.h.b16 %v53_v5  ;;  %v55_v12 = vld [vmem:[%s4093_s1 + $0x58] sm:$0xff] }
   0x7   :  { %v3457_v4 = vld [vmem:[%s4093_s1 + $0x1c] sm:$0xf0]  ;;  %v2408_v9 = vld [vmem:[%s4093_s1 + $0x20] sm:$0xf0]  ;;  %v108_v13 = vunpack.c.l.b16 %v55_v12  ;;  %v109_v14 = vunpack.c.h.b16 %v55_v12  ;;  %v2414_v21 = vld [vmem:[%s4093_s1 + $0x8] sm:$0xf] }
   0x8   :  { %v118_v6 = vpack.c.b16 %v102_v1, %v102_v1  ;;  %v119_v7 = vpack.c.b16 %v103_v2, %v103_v2  ;;  %v120_v17 = vpack.c.b16 %v104_v10, %v104_v10  ;;  %v121_v18 = vpack.c.b16 %v105_v11, %v105_v11  ;;  %v3458_v22 = vld [vmem:[%s4093_s1 + $0x24] sm:$0xf0]  ;;  %v3454_v25 = vld [vmem:[%s4093_s1 + $0xc] sm:$0xf]  ;;  %v3817_v29 = vld [vmem:[%s4092_s0] sm:$0xf] }
   0x9   :  { %v2407_v19 = vor.u32 %v3457_v4, %v2406_v3  ;;  %v2411_v20 = vor.u32 %v3453_v8, %v2408_v9  ;;  %v2416_v26 = vld [vmem:[%s4093_s1 + $0x28] sm:$0xf0]  ;;  %v124_v27 = vpack.c.b16 %v108_v13, %v108_v13  ;;  %v125_v28 = vpack.c.b16 %v109_v14, %v109_v14  ;;  %v2430_v32 = vld [vmem:[%s4093_s1 + $0x18] sm:$0xf]  ;;  %v3456_v34 = vld [vmem:[%s4093_s1 + $0x1c] sm:$0xf] }
   0xa   :  { %v140_v15 = vsel %vm138_vm0, %v118_v6, 0  ;;  %v143_v16 = vsel %vm138_vm0, %v119_v7, 0  ;;  %v146_v23 = vsel %vm138_vm0, %v120_v17, 0  ;;  %v149_v24 = vsel %vm138_vm0, %v121_v18, 0  ;;  %v3460_v33 = vld [vmem:[%s4093_s1 + $0x34] sm:$0xf0] }
   0xb   :  { %169 = vmatpush.bf16.msra.mxu2 %v140_v15  ;;  %182 = vmatpush.bf16.msra.mxu3 %v143_v16  ;;  %v2415_v30 = vor.u32 %v3458_v22, %v2414_v21  ;;  %v2419_v31 = vor.u32 %v3454_v25, %v2416_v26  ;;  %v158_v35 = vsel %vm138_vm0, %v124_v27, 0  ;;  %v161_v36 = vsel %vm138_vm0, %v125_v28, 0  ;;  %v2432_v37 = vld [vmem:[%s4093_s1 + $0x38] sm:$0xf0]  ;;  %v54_v38 = vld [vmem:[%s4093_s1 + $0x50] sm:$0xff] }
   0xc   :  { %v106_v39 = vunpack.c.l.b16 %v54_v38  ;;  %v107_v40 = vunpack.c.h.b16 %v54_v38  ;;  %v2431_v41 = vor.u32 %v3460_v33, %v2430_v32  ;;  %v2422_v42 = vld [vmem:[%s4093_s1 + $0x10] sm:$0xf]  ;;  %v2435_v44 = vor.u32 %v3456_v34, %v2432_v37  ;;  %v3455_v47 = vld [vmem:[%s4093_s1 + $0x14] sm:$0xf]  ;;  %v2530_v49 = vld [vmem:[#allocation2 + $0xa8] sm:$0xf] }
   0xd   :  { %v3459_v43 = vld [vmem:[%s4093_s1 + $0x2c] sm:$0xf0]  ;;  %v2424_v48 = vld [vmem:[%s4093_s1 + $0x30] sm:$0xf0]  ;;  %v2626_v51 = vld [vmem:[#allocation2 + $0x168] sm:$0xf] }
   0xe   :  { %v122_v45 = vpack.c.b16 %v106_v39, %v106_v39  ;;  %v123_v46 = vpack.c.b16 %v107_v40, %v107_v40  ;;  %v3483_v50 = vld [vmem:[#allocation2 + $0xb0] sm:$0xf0]  ;;  %v2423_v55 = vor.u32 %v3459_v43, %v2422_v42  ;;  %v2427_v56 = vor.u32 %v3455_v47, %v2424_v48  ;;  %v2518_v59 = vld [vmem:[#allocation2 + $0x90] sm:$0xf]  ;;  %v3480_v60 = vld [vmem:[#allocation2 + $0x98] sm:$0xf0] }
   0xf   :  { %170 = vmatpush.bf16.msra.mxu2 %v2407_v19  ;;  %183 = vmatpush.bf16.msra.mxu3 %v2411_v20  ;;  %v3507_v52 = vld [vmem:[#allocation2 + $0x170] sm:$0xf0]  ;;  %v2531_v57 = vor.u32 %v3483_v50, %v2530_v49  ;;  %v2614_v61 = vld [vmem:[#allocation2 + $0x150] sm:$0xf]  ;;  %v3504_v62 = vld [vmem:[#allocation2 + $0x158] sm:$0xf0]  ;;  %v2519_v3 = vor.u32 %v3480_v60, %v2518_v59 }
  0x10   :  { %v152_v53 = vsel %vm138_vm0, %v122_v45, 0  ;;  %v155_v54 = vsel %vm138_vm0, %v123_v46, 0  ;;  %v2627_v58 = vor.u32 %v3507_v52, %v2626_v51  ;;  %v2722_v63 = vld [vmem:[#allocation2 + $0x228] sm:$0xf]  ;;  %v3531_v0 = vld [vmem:[#allocation2 + $0x230] sm:$0xf0]  ;;  %v2615_v4 = vor.u32 %v3504_v62, %v2614_v61 }
  0x11   :  { %221 = vmatpush.bf16.msra.mxu0 %v152_v53  ;;  %234 = vmatpush.bf16.msra.mxu1 %v155_v54  ;;  %v2818_v1 = vld [vmem:[#allocation2 + $0x2e8] sm:$0xf]  ;;  %v3555_v2 = vld [vmem:[#allocation2 + $0x2f0] sm:$0xf0]  ;;  %v2506_v5 = vld [vmem:[#allocation2 + $0x78] sm:$0xf]  ;;  %v2723_v9 = vor.u32 %v3531_v0, %v2722_v63 }
  0x12   :  { %2436 = vmatmul.msk.bf16.vlgmr.msra.gmra.mxu2 %vm134_vm1, %v3817_v29  ;;  %2437 = vmatmul.msk.bf16.vlgmr.msra.gmra.mxu3 %vm134_vm1, %v3817_v29  ;;  %v3477_v6 = vld [vmem:[#allocation2 + $0x80] sm:$0xf0]  ;;  %v2602_v7 = vld [vmem:[#allocation2 + $0x138] sm:$0xf]  ;;  %v2819_v10 = vor.u32 %v3555_v2, %v2818_v1  ;;  %v2710_v11 = vld [vmem:[#allocation2 + $0x210] sm:$0xf] }
  0x13   :  { %195 = vmatpush.bf16.msrb.mxu2 %v146_v23  ;;  %208 = vmatpush.bf16.msrb.mxu3 %v149_v24  ;;  %v3501_v8 = vld [vmem:[#allocation2 + $0x140] sm:$0xf0]  ;;  %v3528_v12 = vld [vmem:[#allocation2 + $0x218] sm:$0xf0]  ;;  %v2806_v13 = vld [vmem:[#allocation2 + $0x2d0] sm:$0xf]  ;;  %v2507_v15 = vor.u32 %v3477_v6, %v2506_v5 }
  0x14   :  { %v3552_v14 = vld [vmem:[#allocation2 + $0x2d8] sm:$0xf0]  ;;  %v2603_v16 = vor.u32 %v3501_v8, %v2602_v7  ;;  %v2494_v17 = vld [vmem:[#allocation2 + $0x60] sm:$0xf]  ;;  %v3474_v18 = vld [vmem:[#allocation2 + $0x68] sm:$0xf0]  ;;  %v2711_v21 = vor.u32 %v3528_v12, %v2710_v11 }
  0x15   :  { %222 = vmatpush.bf16.msra.mxu0 %v2423_v55  ;;  %235 = vmatpush.bf16.msra.mxu1 %v2427_v56  ;;  %v2590_v19 = vld [vmem:[#allocation2 + $0x120] sm:$0xf]  ;;  %v3498_v20 = vld [vmem:[#allocation2 + $0x128] sm:$0xf0]  ;;  %v2807_v22 = vor.u32 %v3552_v14, %v2806_v13  ;;  %v2698_v23 = vld [vmem:[#allocation2 + $0x1f8] sm:$0xf]  ;;  %v2495_v27 = vor.u32 %v3474_v18, %v2494_v17 }
  0x16   :  { %v3525_v24 = vld [vmem:[#allocation2 + $0x200] sm:$0xf0]  ;;  %v2794_v25 = vld [vmem:[#allocation2 + $0x2b8] sm:$0xf]  ;;  %v2591_v28 = vor.u32 %v3498_v20, %v2590_v19  ;;  %v2578_v32 = vld [vmem:[#allocation2 + $0x108] sm:$0xf] }
  0x17   :  { %196 = vmatpush.bf16.msrb.mxu2 %v2415_v30  ;;  %209 = vmatpush.bf16.msrb.mxu3 %v2419_v31  ;;  %v3549_v26 = vld [vmem:[#allocation2 + $0x2c0] sm:$0xf0]  ;;  %v2482_v30 = vld [vmem:[#allocation2 + $0x48] sm:$0xf]  ;;  %v3471_v31 = vld [vmem:[#allocation2 + $0x50] sm:$0xf0]  ;;  %v2699_v34 = vor.u32 %v3525_v24, %v2698_v23 }
  0x18   :  { %2440 = vmatmul.msk.bf16.vlgmr.msra.gmra.mxu0 %vm134_vm1, %v3817_v29  ;;  %2441 = vmatmul.msk.bf16.vlgmr.msra.gmra.mxu1 %vm134_vm1, %v3817_v29  ;;  %v3495_v33 = vld [vmem:[#allocation2 + $0x110] sm:$0xf0]  ;;  %v3522_v37 = vld [vmem:[#allocation2 + $0x1e8] sm:$0xf0]  ;;  %v2782_v38 = vld [vmem:[#allocation2 + $0x2a0] sm:$0xf]  ;;  %v2483_v40 = vor.u32 %v3471_v31, %v2482_v30 }
  0x19   :  { %941 = vmatpush.bf16.msrb.mxu0 %v2531_v57  ;;  %954 = vmatpush.bf16.msrb.mxu1 %v2627_v58  ;;  %v3546_v39 = vld [vmem:[#allocation2 + $0x2a8] sm:$0xf0]  ;;  %v2470_v42 = vld [vmem:[#allocation2 + $0x30] sm:$0xf]  ;;  %v3468_v43 = vld [vmem:[#allocation2 + $0x38] sm:$0xf0] }
  0x1a   :  { %v3492_v45 = vld [vmem:[#allocation2 + $0xf8] sm:$0xf0]  ;;  %v2783_v47 = vor.u32 %v3546_v39, %v2782_v38  ;;  %v2674_v48 = vld [vmem:[#allocation2 + $0x1c8] sm:$0xf]  ;;  %v3519_v49 = vld [vmem:[#allocation2 + $0x1d0] sm:$0xf0]  ;;  %v2471_v52 = vor.u32 %v3468_v43, %v2470_v42 }
  0x1b   :  { %247 = vmatpush.bf16.msra.mxu2 %v158_v35  ;;  %260 = vmatpush.bf16.msra.mxu3 %v161_v36  ;;  %v2795_v35 = vor.u32 %v3549_v26, %v2794_v25  ;;  %v2686_v36 = vld [vmem:[#allocation2 + $0x1e0] sm:$0xf]  ;;  %v2770_v50 = vld [vmem:[#allocation2 + $0x288] sm:$0xf]  ;;  %v3543_v51 = vld [vmem:[#allocation2 + $0x290] sm:$0xf0]  ;;  %v2675_v58 = vor.u32 %v3519_v49, %v2674_v48 }
  0x1c   :  { %v2687_v46 = vor.u32 %v3522_v37, %v2686_v36  ;;  %v2458_v54 = vld [vmem:[#allocation2 + $0x18] sm:$0xf]  ;;  %v3465_v55 = vld [vmem:[#allocation2 + $0x20] sm:$0xf0]  ;;  %v2771_v59 = vor.u32 %v3543_v51, %v2770_v50  ;;  %v2662_v60 = vld [vmem:[#allocation2 + $0x1b0] sm:$0xf] }
  0x1d   :  { %942 = vmatpush.bf16.msrb.mxu0 %v2519_v3  ;;  %955 = vmatpush.bf16.msrb.mxu1 %v2615_v4  ;;  %v2554_v56 = vld [vmem:[#allocation2 + $0xd8] sm:$0xf]  ;;  %v3489_v57 = vld [vmem:[#allocation2 + $0xe0] sm:$0xf0]  ;;  %v3516_v61 = vld [vmem:[#allocation2 + $0x1b8] sm:$0xf0]  ;;  %v2459_v0 = vor.u32 %v3465_v55, %v2458_v54 }
  0x1e   :  { %v2758_v62 = vld [vmem:[#allocation2 + $0x270] sm:$0xf]  ;;  %v3540_v63 = vld [vmem:[#allocation2 + $0x278] sm:$0xf0]  ;;  %v2555_v1 = vor.u32 %v3489_v57, %v2554_v56  ;;  %v2446_v2 = vld [vmem:[#allocation2] sm:$0xf] }
  0x1f   :  { %248 = vmatpush.bf16.msra.mxu2 %v2431_v41  ;;  %261 = vmatpush.bf16.msra.mxu3 %v2435_v44  ;;  %v2579_v41 = vor.u32 %v3495_v33, %v2578_v32  ;;  %v2566_v44 = vld [vmem:[#allocation2 + $0xf0] sm:$0xf]  ;;  %v3462_v3 = vld [vmem:[#allocation2 + $0x8] sm:$0xf0]  ;;  %v2542_v4 = vld [vmem:[#allocation2 + $0xc0] sm:$0xf]  ;;  %v2759_v11 = vor.u32 %v3540_v63, %v2758_v62 }
  0x20   :  { %v2567_v53 = vor.u32 %v3492_v45, %v2566_v44  ;;  %v3486_v5 = vld [vmem:[#allocation2 + $0xc8] sm:$0xf0]  ;;  %v2532_v7 = vld [vmem:[#allocation2 + $0xb4] sm:$0xf0]  ;;  %v3513_v13 = vld [vmem:[#allocation2 + $0x1a0] sm:$0xf0] }
  0x21   :  { %943 = vmatpush.bf16.msrb.mxu0 %v2507_v15  ;;  %956 = vmatpush.bf16.msrb.mxu1 %v2603_v16  ;;  %v3482_v6 = vld [vmem:[#allocation2 + $0xac] sm:$0xf]  ;;  %v2650_v12 = vld [vmem:[#allocation2 + $0x198] sm:$0xf]  ;;  %v3537_v15 = vld [vmem:[#allocation2 + $0x260] sm:$0xf0]  ;;  %v2447_v16 = vor.u32 %v3462_v3, %v2446_v2  ;;  %v2543_v17 = vor.u32 %v3486_v5, %v2542_v4 }
  0x22   :  { %2438 = vmatmul.msk.bf16.vlgmr.msrb.gmra.mxu2 %vm134_vm1, %v3817_v29  ;;  %2439 = vmatmul.msk.bf16.vlgmr.msrb.gmra.mxu3 %vm134_vm1, %v3817_v29  ;;  %v3506_v8 = vld [vmem:[#allocation2 + $0x16c] sm:$0xf]  ;;  %v2746_v14 = vld [vmem:[#allocation2 + $0x258] sm:$0xf]  ;;  %v2535_v18 = vor.u32 %v3482_v6, %v2532_v7  ;;  %v2520_v20 = vld [vmem:[#allocation2 + $0x9c] sm:$0xf0]  ;;  %v2651_v23 = vor.u32 %v3513_v13, %v2650_v12 }
  0x23   :  { %967 = vmatpush.bf16.msrb.mxu2 %v2723_v9  ;;  %980 = vmatpush.bf16.msrb.mxu3 %v2819_v10  ;;  %v2628_v9 = vld [vmem:[#allocation2 + $0x174] sm:$0xf0]  ;;  %v2663_v10 = vor.u32 %v3516_v61, %v2662_v60  ;;  %v2747_v24 = vor.u32 %v3537_v15, %v2746_v14  ;;  %v2638_v25 = vld [vmem:[#allocation2 + $0x180] sm:$0xf]  ;;  %v3510_v26 = vld [vmem:[#allocation2 + $0x188] sm:$0xf0] }
  0x24   :  { %v2631_v19 = vor.u32 %v3506_v8, %v2628_v9  ;;  %v3530_v30 = vld [vmem:[#allocation2 + $0x22c] sm:$0xf]  ;;  %v2724_v31 = vld [vmem:[#allocation2 + $0x234] sm:$0xf0]  ;;  %v3476_v36 = vld [vmem:[#allocation2 + $0x7c] sm:$0xf] }
  0x25   :  { %944 = vmatpush.bf16.msrb.mxu0 %v2495_v27  ;;  %957 = vmatpush.bf16.msrb.mxu1 %v2591_v28  ;;  %v2734_v27 = vld [vmem:[#allocation2 + $0x240] sm:$0xf]  ;;  %v3534_v28 = vld [vmem:[#allocation2 + $0x248] sm:$0xf0]  ;;  %v2820_v33 = vld [vmem:[#allocation2 + $0x2f4] sm:$0xf0]  ;;  %v2727_v42 = vor.u32 %v3530_v30, %v2724_v31 }
  0x26   :  { %v3554_v32 = vld [vmem:[#allocation2 + $0x2ec] sm:$0xf]  ;;  %v2508_v37 = vld [vmem:[#allocation2 + $0x84] sm:$0xf0]  ;;  %v3500_v38 = vld [vmem:[#allocation2 + $0x13c] sm:$0xf] }
  0x27   :  { %968 = vmatpush.bf16.msrb.mxu2 %v2711_v21  ;;  %981 = vmatpush.bf16.msrb.mxu3 %v2807_v22  ;;  %v3503_v21 = vld [vmem:[#allocation2 + $0x154] sm:$0xf]  ;;  %v2616_v22 = vld [vmem:[#allocation2 + $0x15c] sm:$0xf0]  ;;  %v2604_v39 = vld [vmem:[#allocation2 + $0x144] sm:$0xf0]  ;;  %v2823_v43 = vor.u32 %v3554_v32, %v2820_v33  ;;  %v2511_v44 = vor.u32 %v3476_v36, %v2508_v37 }
  0x28   :  { %v2607_v45 = vor.u32 %v3500_v38, %v2604_v39  ;;  %v3497_v48 = vld [vmem:[#allocation2 + $0x124] sm:$0xf]  ;;  %v2592_v49 = vld [vmem:[#allocation2 + $0x12c] sm:$0xf0]  ;;  %v3494_v54 = vld [vmem:[#allocation2 + $0x10c] sm:$0xf] }
  0x29   :  { %945 = vmatpush.bf16.msrb.mxu0 %v2483_v40  ;;  %958 = vmatpush.bf16.msrb.mxu1 %v2579_v41  ;;  %v2639_v40 = vor.u32 %v3510_v26, %v2638_v25  ;;  %v2735_v41 = vor.u32 %v3534_v28, %v2734_v27  ;;  %v2595_v51 = vor.u32 %v3497_v48, %v2592_v49  ;;  %v2580_v55 = vld [vmem:[#allocation2 + $0x114] sm:$0xf0]  ;;  %v3491_v61 = vld [vmem:[#allocation2 + $0xf4] sm:$0xf]  ;;  %v2568_v62 = vld [vmem:[#allocation2 + $0xfc] sm:$0xf0] }
  0x2a   :  { %v2583_v57 = vor.u32 %v3494_v54, %v2580_v55  ;;  %v3527_v63 = vld [vmem:[#allocation2 + $0x214] sm:$0xf]  ;;  %v2808_v3 = vld [vmem:[#allocation2 + $0x2dc] sm:$0xf0]  ;;  %v3464_v6 = vld [vmem:[#allocation2 + $0x1c] sm:$0xf] }
  0x2b   :  { %969 = vmatpush.bf16.msrb.mxu2 %v2699_v34  ;;  %982 = vmatpush.bf16.msrb.mxu3 %v2795_v35  ;;  %v2619_v35 = vor.u32 %v3503_v21, %v2616_v22  ;;  %v3551_v2 = vld [vmem:[#allocation2 + $0x2d4] sm:$0xf]  ;;  %v2460_v7 = vld [vmem:[#allocation2 + $0x24] sm:$0xf0]  ;;  %v3488_v8 = vld [vmem:[#allocation2 + $0xdc] sm:$0xf] }
  0x2c   :  { %v2811_v5 = vor.u32 %v3551_v2, %v2808_v3  ;;  %v2463_v9 = vor.u32 %v3464_v6, %v2460_v7  ;;  %v2700_v12 = vld [vmem:[#allocation2 + $0x204] sm:$0xf0]  ;;  %v3548_v15 = vld [vmem:[#allocation2 + $0x2bc] sm:$0xf]  ;;  %v2544_v21 = vld [vmem:[#allocation2 + $0xcc] sm:$0xf0] }
  0x2d   :  { %946 = vmatpush.bf16.msrb.mxu0 %v2471_v52  ;;  %959 = vmatpush.bf16.msrb.mxu1 %v2567_v53  ;;  %v3470_v52 = vld [vmem:[#allocation2 + $0x4c] sm:$0xf]  ;;  %v2484_v53 = vld [vmem:[#allocation2 + $0x54] sm:$0xf0]  ;;  %v3521_v22 = vld [vmem:[#allocation2 + $0x1e4] sm:$0xf] }
  0x2e   :  { %v2487_v56 = vor.u32 %v3470_v52, %v2484_v53  ;;  %v3545_v26 = vld [vmem:[#allocation2 + $0x2a4] sm:$0xf]  ;;  %v2784_v27 = vld [vmem:[#allocation2 + $0x2ac] sm:$0xf0]  ;;  %v3518_v30 = vld [vmem:[#allocation2 + $0x1cc] sm:$0xf] }
  0x2f   :  { %970 = vmatpush.bf16.msrb.mxu2 %v2687_v46  ;;  %983 = vmatpush.bf16.msrb.mxu3 %v2783_v47  ;;  %v3473_v46 = vld [vmem:[#allocation2 + $0x64] sm:$0xf]  ;;  %v2496_v47 = vld [vmem:[#allocation2 + $0x6c] sm:$0xf0]  ;;  %v2787_v28 = vor.u32 %v3545_v26, %v2784_v27  ;;  %v2676_v31 = vld [vmem:[#allocation2 + $0x1d4] sm:$0xf0] }
  0x30   :  { %v2499_v50 = vor.u32 %v3473_v46, %v2496_v47  ;;  %v3542_v32 = vld [vmem:[#allocation2 + $0x28c] sm:$0xf]  ;;  %v2679_v33 = vor.u32 %v3518_v30, %v2676_v31  ;;  %v3515_v36 = vld [vmem:[#allocation2 + $0x1b4] sm:$0xf]  ;;  %v2664_v37 = vld [vmem:[#allocation2 + $0x1bc] sm:$0xf0] }
  0x31   :  { %947 = vmatpush.bf16.msrb.mxu0 %v2459_v0  ;;  %960 = vmatpush.bf16.msrb.mxu1 %v2555_v1  ;;  %v2571_v0 = vor.u32 %v3491_v61, %v2568_v62  ;;  %v2712_v1 = vld [vmem:[#allocation2 + $0x21c] sm:$0xf0]  ;;  %v2667_v38 = vor.u32 %v3515_v36, %v2664_v37  ;;  %v3539_v39 = vld [vmem:[#allocation2 + $0x274] sm:$0xf]  ;;  %v2748_v46 = vld [vmem:[#allocation2 + $0x264] sm:$0xf0] }
  0x32   :  { %2442 = vmatmul.msk.bf16.vlgmr.msra.gmra.mxu2 %vm134_vm1, %v3817_v29  ;;  %2443 = vmatmul.msk.bf16.vlgmr.msra.gmra.mxu3 %vm134_vm1, %v3817_v29  ;;  %v3479_v29 = vld [vmem:[#allocation2 + $0x94] sm:$0xf]  ;;  %v2715_v4 = vor.u32 %v3527_v63, %v2712_v1  ;;  %v3509_v48 = vld [vmem:[#allocation2 + $0x184] sm:$0xf]  ;;  %v2640_v49 = vld [vmem:[#allocation2 + $0x18c] sm:$0xf0] }
  0x33   :  { %971 = vmatpush.bf16.msrb.mxu2 %v2675_v58  ;;  %984 = vmatpush.bf16.msrb.mxu3 %v2771_v59  ;;  %v2523_v34 = vor.u32 %v3479_v29, %v2520_v20  ;;  %v3467_v58 = vld [vmem:[#allocation2 + $0x34] sm:$0xf]  ;;  %v2472_v59 = vld [vmem:[#allocation2 + $0x3c] sm:$0xf0]  ;;  %v3485_v29 = vld [vmem:[#allocation2 + $0xc4] sm:$0xf] }
  0x34   :  { %v2475_v60 = vor.u32 %v3467_v58, %v2472_v59  ;;  %v2736_v52 = vld [vmem:[#allocation2 + $0x24c] sm:$0xf0]  ;;  %v3869_v53 = vld [vmem:[%s4094_s2] sm:$0xff]  ;;  %v3484_v1 = vld [vmem:[#allocation2 + $0xb8] sm:$0xf0]  ;;  %vm2397_vm2 = vcmask 15360  }
  0x35   :  { %948 = vmatpush.bf16.msrb.mxu0 %v2447_v16  ;;  %961 = vmatpush.bf16.msrb.mxu1 %v2543_v17  ;;  %v2796_v16 = vld [vmem:[#allocation2 + $0x2c4] sm:$0xf0]  ;;  %v58_v55 = vperm.slane %v3869_v53, 0  ;;  %v2538_v63 = vld [vmem:[#allocation2 + $0xb0] sm:$0xf] }
  0x36   :  { %v2799_v17 = vor.u32 %v3548_v15, %v2796_v16  ;;  %v2634_v2 = vld [vmem:[#allocation2 + $0x170] sm:$0xf]  ;;  %v3508_v3 = vld [vmem:[#allocation2 + $0x178] sm:$0xf0]  ;;  %v3505_v15 = vld [vmem:[#allocation2 + $0x160] sm:$0xf0] }
  0x37   :  { %972 = vmatpush.bf16.msrb.mxu2 %v2663_v10  ;;  %985 = vmatpush.bf16.msrb.mxu3 %v2759_v11  ;;  %v2556_v10 = vld [vmem:[#allocation2 + $0xe4] sm:$0xf0]  ;;  %v3524_v11 = vld [vmem:[#allocation2 + $0x1fc] sm:$0xf]  ;;  %v3475_v31 = vld [vmem:[#allocation2 + $0x70] sm:$0xf0] }
  0x38   :  { %v2559_v13 = vor.u32 %v3488_v8, %v2556_v10  ;;  %v2703_v14 = vor.u32 %v3524_v11, %v2700_v12  ;;  %v2539_v8 = vor.u32 %v3484_v1, %v2538_v63  ;;  %v2526_v10 = vld [vmem:[#allocation2 + $0x98] sm:$0xf]  ;;  %v2502_v27 = vld [vmem:[#allocation2 + $0x68] sm:$0xf]  ;;  %v3529_v63 = vld [vmem:[#allocation2 + $0x220] sm:$0xf0] }
  0x39   :  { %993 = vmatpush.bf16.msra.mxu0 %v2535_v18  ;;  %1006 = vmatpush.bf16.msra.mxu1 %v2631_v19  ;;  %v3461_v18 = vld [vmem:[#allocation2 + $0x4] sm:$0xf]  ;;  %v2448_v19 = vld [vmem:[#allocation2 + $0xc] sm:$0xf0]  ;;  %v2503_v36 = vor.u32 %v3475_v31, %v2502_v27  ;;  %v2915_v27 = vld [vmem:[#allocation2 + $0x3a8] sm:$0xf] }
  0x3a   :  { %v2451_v20 = vor.u32 %v3461_v18, %v2448_v19  ;;  %v60_v18 = vperm.slane %v3869_v53, 2  ;;  %v61_v19 = vperm.slane %v3869_v53, 3  ;;  %v3553_v1 = vld [vmem:[#allocation2 + $0x2e0] sm:$0xf0]  ;;  %v3603_v31 = vld [vmem:[#allocation2 + $0x470] sm:$0xf0] }
  0x3b   :  { %973 = vmatpush.bf16.msrb.mxu2 %v2651_v23  ;;  %986 = vmatpush.bf16.msrb.mxu3 %v2747_v24  ;;  %v2688_v23 = vld [vmem:[#allocation2 + $0x1ec] sm:$0xf0]  ;;  %v2547_v24 = vor.u32 %v3485_v29, %v2544_v21  ;;  %v2514_v29 = vld [vmem:[#allocation2 + $0x80] sm:$0xf] }
  0x3c   :  { %v2691_v25 = vor.u32 %v3521_v22, %v2688_v23  ;;  %v2610_v21 = vld [vmem:[#allocation2 + $0x140] sm:$0xf]  ;;  %v3502_v22 = vld [vmem:[#allocation2 + $0x148] sm:$0xf0] }
  0x3d   :  { %994 = vmatpush.bf16.msra.mxu0 %v2523_v34  ;;  %1007 = vmatpush.bf16.msra.mxu1 %v2619_v35  ;;  %v2772_v34 = vld [vmem:[#allocation2 + $0x294] sm:$0xf0]  ;;  %v2611_v26 = vor.u32 %v3502_v22, %v2610_v21  ;;  %v3487_v22 = vld [vmem:[#allocation2 + $0xd0] sm:$0xf0] }
  0x3e   :  { %v2775_v35 = vor.u32 %v3542_v32, %v2772_v34  ;;  %v2598_v32 = vld [vmem:[#allocation2 + $0x128] sm:$0xf] }
  0x3f   :  { %974 = vmatpush.bf16.msrb.mxu2 %v2639_v40  ;;  %987 = vmatpush.bf16.msrb.mxu3 %v2735_v41  ;;  %v2760_v40 = vld [vmem:[#allocation2 + $0x27c] sm:$0xf0] }
  0x40   :  { %v2763_v41 = vor.u32 %v3539_v39, %v2760_v40  ;;  %v2490_v39 = vld [vmem:[#allocation2 + $0x50] sm:$0xf]  ;;  %v3472_v40 = vld [vmem:[#allocation2 + $0x58] sm:$0xf0] }
  0x41   :  { %995 = vmatpush.bf16.msra.mxu0 %v2511_v44  ;;  %1008 = vmatpush.bf16.msra.mxu1 %v2607_v45  ;;  %v3536_v44 = vld [vmem:[#allocation2 + $0x25c] sm:$0xf] }
  0x42   :  { %v2751_v47 = vor.u32 %v3536_v44, %v2748_v46  ;;  %v3532_v46 = vld [vmem:[#allocation2 + $0x238] sm:$0xf0] }
  0x43   :  { %1019 = vmatpush.bf16.msra.mxu2 %v2727_v42  ;;  %1032 = vmatpush.bf16.msra.mxu3 %v2823_v43  ;;  %v3512_v42 = vld [vmem:[#allocation2 + $0x19c] sm:$0xf]  ;;  %v2652_v43 = vld [vmem:[#allocation2 + $0x1a4] sm:$0xf0] }
  0x44   :  { %v2655_v45 = vor.u32 %v3512_v42, %v2652_v43  ;;  %v3496_v42 = vld [vmem:[#allocation2 + $0x118] sm:$0xf0]  ;;  %v2730_v43 = vld [vmem:[#allocation2 + $0x230] sm:$0xf] }
  0x45   :  { %996 = vmatpush.bf16.msra.mxu0 %v2499_v50  ;;  %1009 = vmatpush.bf16.msra.mxu1 %v2595_v51  ;;  %v3533_v50 = vld [vmem:[#allocation2 + $0x244] sm:$0xf]  ;;  %v2643_v51 = vor.u32 %v3509_v48, %v2640_v49  ;;  %v3556_v48 = vld [vmem:[#allocation2 + $0x2f8] sm:$0xf0] }
  0x46   :  { %v2739_v54 = vor.u32 %v3533_v50, %v2736_v52 }
  0x47   :  { %1020 = vmatpush.bf16.msra.mxu2 %v2715_v4  ;;  %1033 = vmatpush.bf16.msra.mxu3 %v2811_v5 }
  0x49   :  { %997 = vmatpush.bf16.msra.mxu0 %v2487_v56  ;;  %1010 = vmatpush.bf16.msra.mxu1 %v2583_v57  ;;  %v59_v56 = vperm.slane %v3869_v53, 1 }
  0x4b   :  { %1021 = vmatpush.bf16.msra.mxu2 %v2703_v14  ;;  %1034 = vmatpush.bf16.msra.mxu3 %v2799_v17  ;;  %v2622_v14 = vld [vmem:[#allocation2 + $0x158] sm:$0xf] }
  0x4c   :  { %v2623_v17 = vor.u32 %v3505_v15, %v2622_v14  ;;  %v2802_v14 = vld [vmem:[#allocation2 + $0x2c0] sm:$0xf]  ;;  %v3550_v15 = vld [vmem:[#allocation2 + $0x2c8] sm:$0xf0] }
  0x4d   :  { %998 = vmatpush.bf16.msra.mxu0 %v2475_v60  ;;  %1011 = vmatpush.bf16.msra.mxu1 %v2571_v0  ;;  %v2803_v21 = vor.u32 %v3550_v15, %v2802_v14 }
  0x4f   :  { %1022 = vmatpush.bf16.msra.mxu2 %v2691_v25  ;;  %1035 = vmatpush.bf16.msra.mxu3 %v2787_v28 }
  0x51   :  { %999 = vmatpush.bf16.msra.mxu0 %v2463_v9  ;;  %1012 = vmatpush.bf16.msra.mxu1 %v2559_v13  ;;  %v2635_v9 = vor.u32 %v3508_v3, %v2634_v2  ;;  %v3481_v13 = vld [vmem:[#allocation2 + $0xa0] sm:$0xf0] }
  0x52   :  { %v2527_v16 = vor.u32 %v3481_v13, %v2526_v10  ;;  %v2706_v10 = vld [vmem:[#allocation2 + $0x200] sm:$0xf]  ;;  %v3526_v13 = vld [vmem:[#allocation2 + $0x208] sm:$0xf0] }
  0x53   :  { %1023 = vmatpush.bf16.msra.mxu2 %v2679_v33  ;;  %1036 = vmatpush.bf16.msra.mxu3 %v2775_v35  ;;  %v3499_v33 = vld [vmem:[#allocation2 + $0x130] sm:$0xf0] }
  0x54   :  { %v2599_v37 = vor.u32 %v3499_v33, %v2598_v32 }
  0x55   :  { %1000 = vmatpush.bf16.msra.mxu0 %v2451_v20  ;;  %1013 = vmatpush.bf16.msra.mxu1 %v2547_v24  ;;  %v3478_v20 = vld [vmem:[#allocation2 + $0x88] sm:$0xf0] }
  0x56   :  { %v2515_v25 = vor.u32 %v3478_v20, %v2514_v29  ;;  %v2550_v29 = vld [vmem:[#allocation2 + $0xc8] sm:$0xf]  ;;  %v2707_v20 = vor.u32 %v3526_v13, %v2706_v10 }
  0x57   :  { %1024 = vmatpush.bf16.msra.mxu2 %v2667_v38  ;;  %1037 = vmatpush.bf16.msra.mxu3 %v2763_v41  ;;  %v2586_v41 = vld [vmem:[#allocation2 + $0x110] sm:$0xf]  ;;  %v2551_v33 = vor.u32 %v3487_v22, %v2550_v29  ;;  %v2867_v22 = vld [vmem:[#allocation2 + $0x348] sm:$0xf] }
  0x5b   :  { %1025 = vmatpush.bf16.msra.mxu2 %v2655_v45  ;;  %1038 = vmatpush.bf16.msra.mxu3 %v2751_v47  ;;  %v2826_v47 = vld [vmem:[#allocation2 + $0x2f0] sm:$0xf] }
  0x5f   :  { %1026 = vmatpush.bf16.msra.mxu2 %v2643_v51  ;;  %1039 = vmatpush.bf16.msra.mxu3 %v2739_v54  ;;  %v2491_v54 = vor.u32 %v3472_v40, %v2490_v39  ;;  %v2778_v40 = vld [vmem:[#allocation2 + $0x290] sm:$0xf] }
  0x95   :  { %v172_v57 = vpop.f32.mrf.mxu2  ;;  %v185_v58 = vpop.f32.mrf.mxu3 }
  0x96   :  { %v173_v59 = vadd.f32 %v172_v57, %v58_v55  ;;  %v186_v60 = vadd.f32 %v185_v58, %v59_v56  ;;  %v2587_v55 = vor.u32 %v3496_v42, %v2586_v41  ;;  %v2478_v56 = vld [vmem:[#allocation2 + $0x38] sm:$0xf]  ;;  %v3469_v57 = vld [vmem:[#allocation2 + $0x40] sm:$0xf0]  ;;  %v2731_v58 = vor.u32 %v3532_v46, %v2730_v43  ;;  %v3544_v41 = vld [vmem:[#allocation2 + $0x298] sm:$0xf0]  ;;  %v224_v10 = vpop.f32.mrf.mxu0  ;;  %v237_v13 = vpop.f32.mrf.mxu1 }
  0x97   :  { %v2479_v2 = vor.u32 %v3469_v57, %v2478_v56  ;;  %v2903_v42 = vld [vmem:[#allocation2 + $0x390] sm:$0xf]  ;;  %v3576_v43 = vld [vmem:[#allocation2 + $0x398] sm:$0xf0]  ;;  %v3541_v56 = vld [vmem:[#allocation2 + $0x280] sm:$0xf0] }
  0x98   :  { %v267_v61 = vmax.f32 %v173_v59, 0.0  ;;  %v268_v62 = vmax.f32 %v186_v60, 0.0  ;;  %v2827_v59 = vor.u32 %v3556_v48, %v2826_v47  ;;  %v2574_v60 = vld [vmem:[#allocation2 + $0xf8] sm:$0xf]  ;;  %v2779_v47 = vor.u32 %v3544_v41, %v2778_v40  ;;  %v3564_v40 = vld [vmem:[#allocation2 + $0x338] sm:$0xf0] }
  0x99   :  { %v2670_v48 = vld [vmem:[#allocation2 + $0x1b8] sm:$0xf] }
  0x9a   :  { %v275_v0 = vpack.c.bf16 %v268_v62, %v267_v61  ;;  %v3493_v61 = vld [vmem:[#allocation2 + $0x100] sm:$0xf0]  ;;  %v2718_v62 = vld [vmem:[#allocation2 + $0x218] sm:$0xf] }
  0x9b   :  { %v2575_v3 = vor.u32 %v3493_v61, %v2574_v60  ;;  %v2891_v57 = vld [vmem:[#allocation2 + $0x378] sm:$0xf]  ;;  %v3597_v60 = vld [vmem:[#allocation2 + $0x440] sm:$0xf0] }
  0x9c   :  { %v417_v4 = vunpack.c.l.b16 %v275_v0  ;;  %v418_v5 = vunpack.c.h.b16 %v275_v0  ;;  %v2814_v0 = vld [vmem:[#allocation2 + $0x2d8] sm:$0xf] }
  0x9d   :  { %v174_v6 = vpop.f32.mrf.mxu2  ;;  %v187_v7 = vpop.f32.mrf.mxu3 }
  0x9e   :  { %v3873_v11 = vpack.c.b16 %v417_v4, %v417_v4  ;;  %v3875_v12 = vpack.c.b16 %v418_v5, %v418_v5  ;;  %v2466_v4 = vld [vmem:[#allocation2 + $0x20] sm:$0xf]  ;;  %v3466_v5 = vld [vmem:[#allocation2 + $0x28] sm:$0xf0]  ;;  %v2719_v6 = vor.u32 %v3529_v63, %v2718_v62  ;;  %v2815_v7 = vor.u32 %v3553_v1, %v2814_v0 }
  0x9f   :  { %v2658_v1 = vld [vmem:[#allocation2 + $0x1a0] sm:$0xf] }
  0xa0   :  { %949 = vmatmul.bf16.vlgmr.msrb.gmra.mxu0 %v3873_v11  ;;  %962 = vmatmul.bf16.vlgmr.msrb.gmra.mxu1 %v3875_v12 }
  0xa1   :  { %1045 = vmatpush.bf16.msrb.mxu0 %v2539_v8  ;;  %1058 = vmatpush.bf16.msrb.mxu1 %v2635_v9  ;;  %v2562_v8 = vld [vmem:[#allocation2 + $0xe0] sm:$0xf]  ;;  %v3490_v9 = vld [vmem:[#allocation2 + $0xe8] sm:$0xf0] }
  0xa5   :  { %1046 = vmatpush.bf16.msrb.mxu0 %v2527_v16  ;;  %1059 = vmatpush.bf16.msrb.mxu1 %v2623_v17  ;;  %v198_v23 = vpop.f32.mrf.mxu2  ;;  %v211_v24 = vpop.f32.mrf.mxu3  ;;  %v2467_v16 = vor.u32 %v3466_v5, %v2466_v4  ;;  %v2563_v17 = vor.u32 %v3490_v9, %v2562_v8  ;;  %v2754_v5 = vld [vmem:[#allocation2 + $0x260] sm:$0xf]  ;;  %v2646_v9 = vld [vmem:[#allocation2 + $0x188] sm:$0xf] }
  0xa6   :  { %v199_v28 = vadd.f32 %v198_v23, %v60_v18  ;;  %v212_v30 = vadd.f32 %v211_v24, %v61_v19  ;;  %v2454_v18 = vld [vmem:[#allocation2 + $0x8] sm:$0xf]  ;;  %v3463_v19 = vld [vmem:[#allocation2 + $0x10] sm:$0xf0]  ;;  %v2975_v8 = vld [vmem:[#allocation2 + $0x420] sm:$0xf] }
  0xa7   :  { %v2694_v23 = vld [vmem:[#allocation2 + $0x1e8] sm:$0xf]  ;;  %v3523_v24 = vld [vmem:[#allocation2 + $0x1f0] sm:$0xf0]  ;;  %v2455_v32 = vor.u32 %v3463_v19, %v2454_v18  ;;  %v62_v18 = vperm.slane %v3869_v53, 4  ;;  %v63_v19 = vperm.slane %v3869_v53, 5 }
  0xa8   :  { %v269_v34 = vmax.f32 %v199_v28, 0.0  ;;  %v270_v35 = vmax.f32 %v212_v30, 0.0  ;;  %v3579_v28 = vld [vmem:[#allocation2 + $0x3b0] sm:$0xf0]  ;;  %v3011_v30 = vld [vmem:[#allocation2 + $0x468] sm:$0xf] }
  0xa9   :  { %1047 = vmatpush.bf16.msrb.mxu0 %v2515_v25  ;;  %1060 = vmatpush.bf16.msrb.mxu1 %v2611_v26  ;;  %v2790_v25 = vld [vmem:[#allocation2 + $0x2a8] sm:$0xf]  ;;  %v3547_v26 = vld [vmem:[#allocation2 + $0x2b0] sm:$0xf0]  ;;  %v3012_v39 = vor.u32 %v3603_v31, %v3011_v30 }
  0xaa   :  { %v276_v38 = vpack.c.bf16 %v270_v35, %v269_v34  ;;  %v2695_v34 = vor.u32 %v3523_v24, %v2694_v23  ;;  %v2791_v35 = vor.u32 %v3547_v26, %v2790_v25  ;;  %v3567_v23 = vld [vmem:[#allocation2 + $0x350] sm:$0xf0]  ;;  %v2963_v24 = vld [vmem:[#allocation2 + $0x408] sm:$0xf] }
  0xab   :  { %v3591_v25 = vld [vmem:[#allocation2 + $0x410] sm:$0xf0]  ;;  %v3107_v26 = vld [vmem:[#allocation2 + $0x528] sm:$0xf] }
  0xac   :  { %v419_v44 = vunpack.c.l.b16 %v276_v38  ;;  %v420_v45 = vunpack.c.h.b16 %v276_v38  ;;  %v2916_v38 = vor.u32 %v3579_v28, %v2915_v27  ;;  %v3627_v28 = vld [vmem:[#allocation2 + $0x530] sm:$0xf0]  ;;  %v3203_v30 = vld [vmem:[#allocation2 + $0x5e8] sm:$0xf] }
  0xad   :  { %1048 = vmatpush.bf16.msrb.mxu0 %v2503_v36  ;;  %1061 = vmatpush.bf16.msrb.mxu1 %v2599_v37  ;;  %v200_v49 = vpop.f32.mrf.mxu2  ;;  %v213_v50 = vpop.f32.mrf.mxu3  ;;  %v2682_v36 = vld [vmem:[#allocation2 + $0x1d0] sm:$0xf]  ;;  %v3520_v37 = vld [vmem:[#allocation2 + $0x1d8] sm:$0xf0]  ;;  %v3651_v31 = vld [vmem:[#allocation2 + $0x5f0] sm:$0xf0]  ;;  %v3108_v41 = vor.u32 %v3627_v28, %v3107_v26 }
  0xae   :  { %v3881_v51 = vpack.c.b16 %v419_v44, %v419_v44  ;;  %v3883_v52 = vpack.c.b16 %v420_v45, %v420_v45  ;;  %v2999_v44 = vld [vmem:[#allocation2 + $0x450] sm:$0xf]  ;;  %v3600_v45 = vld [vmem:[#allocation2 + $0x458] sm:$0xf0]  ;;  %v2683_v46 = vor.u32 %v3520_v37, %v2682_v36  ;;  %v3517_v49 = vld [vmem:[#allocation2 + $0x1c0] sm:$0xf0]  ;;  %v2904_v50 = vor.u32 %v3576_v43, %v2903_v42 }
  0xaf   :  { %v2671_v63 = vor.u32 %v3517_v49, %v2670_v48  ;;  %v238_v36 = vadd.f32 %v237_v13, %v63_v19  ;;  %v2868_v37 = vor.u32 %v3567_v23, %v2867_v22  ;;  %v3204_v42 = vor.u32 %v3651_v31, %v3203_v30  ;;  %v2951_v43 = vld [vmem:[#allocation2 + $0x3f0] sm:$0xf]  ;;  %v3648_v48 = vld [vmem:[#allocation2 + $0x5d8] sm:$0xf0]  ;;  %v226_v49 = vpop.f32.mrf.mxu0  ;;  %v3602_v19 = vld [vmem:[#allocation2 + $0x46c] sm:$0xf] }
  0xb0   :  { %975 = vmatmul.bf16.vlgmr.msrb.gmra.mxu2 %v3881_v51  ;;  %988 = vmatmul.bf16.vlgmr.msrb.gmra.mxu3 %v3883_v52  ;;  %v3059_v28 = vld [vmem:[#allocation2 + $0x4c8] sm:$0xf]  ;;  %v3615_v30 = vld [vmem:[#allocation2 + $0x4d0] sm:$0xf0]  ;;  %v3636_v49 = vld [vmem:[#allocation2 + $0x578] sm:$0xf0] }
  0xb1   :  { %1001 = vmatmul.bf16.vlgmr.msra.gmra.mxu0 %v3873_v11  ;;  %1014 = vmatmul.bf16.vlgmr.msra.gmra.mxu1 %v3875_v12 }
  0xb2   :  { %1049 = vmatpush.bf16.msrb.mxu0 %v2491_v54  ;;  %1062 = vmatpush.bf16.msrb.mxu1 %v2587_v55  ;;  %v3000_v54 = vor.u32 %v3600_v45, %v2999_v44  ;;  %v2766_v55 = vld [vmem:[#allocation2 + $0x278] sm:$0xf]  ;;  %v3588_v44 = vld [vmem:[#allocation2 + $0x3f8] sm:$0xf0]  ;;  %v3095_v45 = vld [vmem:[#allocation2 + $0x510] sm:$0xf] }
  0xb3   :  { %1071 = vmatpush.bf16.msrb.mxu2 %v2731_v58  ;;  %1084 = vmatpush.bf16.msrb.mxu3 %v2827_v59  ;;  %v3573_v58 = vld [vmem:[#allocation2 + $0x380] sm:$0xf0]  ;;  %v2987_v59 = vld [vmem:[#allocation2 + $0x438] sm:$0xf]  ;;  %v2767_v0 = vor.u32 %v3541_v56, %v2766_v55  ;;  %v272_v55 = vmax.f32 %v238_v36, 0.0 }
  0xb4   :  { %v2988_v4 = vor.u32 %v3597_v60, %v2987_v59  ;;  %v3561_v59 = vld [vmem:[#allocation2 + $0x320] sm:$0xf0]  ;;  %v2905_v36 = vld [vmem:[#allocation2 + $0x39c] sm:$0xf0] }
  0xb5   :  { %v3893_v61 = vpop.f32.mrf.mxu2  ;;  %v3895_v62 = vpop.f32.mrf.mxu3 }
  0xb6   :  { %1050 = vmatpush.bf16.msrb.mxu0 %v2479_v2  ;;  %1063 = vmatpush.bf16.msrb.mxu1 %v2575_v3  ;;  %v3514_v2 = vld [vmem:[#allocation2 + $0x1a8] sm:$0xf0]  ;;  %v2892_v3 = vor.u32 %v3573_v58, %v2891_v57  ;;  %v2952_v57 = vor.u32 %v3588_v44, %v2951_v43  ;;  %v2843_v58 = vld [vmem:[#allocation2 + $0x318] sm:$0xf]  ;;  %v3047_v44 = vld [vmem:[#allocation2 + $0x4b0] sm:$0xf] }
  0xb7   :  { %1072 = vmatpush.bf16.msrb.mxu2 %v2719_v6  ;;  %1085 = vmatpush.bf16.msrb.mxu3 %v2815_v7  ;;  %v3538_v6 = vld [vmem:[#allocation2 + $0x268] sm:$0xf0]  ;;  %v2879_v7 = vld [vmem:[#allocation2 + $0x360] sm:$0xf]  ;;  %v2659_v14 = vor.u32 %v3514_v2, %v2658_v1  ;;  %v3585_v1 = vld [vmem:[#allocation2 + $0x3e0] sm:$0xf0] }
  0xb8   :  { %v2755_v15 = vor.u32 %v3538_v6, %v2754_v5  ;;  %v3083_v2 = vld [vmem:[#allocation2 + $0x4f8] sm:$0xf]  ;;  %v3645_v5 = vld [vmem:[#allocation2 + $0x5c0] sm:$0xf0] }
  0xba   :  { %1051 = vmatpush.bf16.msrb.mxu0 %v2467_v16  ;;  %1064 = vmatpush.bf16.msrb.mxu1 %v2563_v17  ;;  %v3511_v16 = vld [vmem:[#allocation2 + $0x190] sm:$0xf0]  ;;  %v2742_v17 = vld [vmem:[#allocation2 + $0x248] sm:$0xf] }
  0xbb   :  { %1073 = vmatpush.bf16.msrb.mxu2 %v2707_v20  ;;  %1086 = vmatpush.bf16.msrb.mxu3 %v2803_v21  ;;  %v3535_v21 = vld [vmem:[#allocation2 + $0x250] sm:$0xf0]  ;;  %v2647_v27 = vor.u32 %v3511_v16, %v2646_v9  ;;  %v2927_v9 = vld [vmem:[#allocation2 + $0x3c0] sm:$0xf] }
  0xbc   :  { %v3167_v16 = vld [vmem:[#allocation2 + $0x5a0] sm:$0xf] }
  0xbe   :  { %1052 = vmatpush.bf16.msrb.mxu0 %v2455_v32  ;;  %1065 = vmatpush.bf16.msrb.mxu1 %v2551_v33  ;;  %v252_v32 = vpop.f32.mrf.mxu2  ;;  %v265_v33 = vpop.f32.mrf.mxu3 }
  0xbf   :  { %1074 = vmatpush.bf16.msrb.mxu2 %v2695_v34  ;;  %1087 = vmatpush.bf16.msrb.mxu3 %v2791_v35  ;;  %v2743_v34 = vor.u32 %v3535_v21, %v2742_v17  ;;  %v225_v35 = vadd.f32 %v224_v10, %v62_v18  ;;  %v3578_v17 = vld [vmem:[#allocation2 + $0x3ac] sm:$0xf]  ;;  %v2917_v18 = vld [vmem:[#allocation2 + $0x3b4] sm:$0xf0]  ;;  %v3155_v33 = vld [vmem:[#allocation2 + $0x588] sm:$0xf] }
  0xc0   :  { %1027 = vmatmul.bf16.vlgmr.msra.gmra.mxu2 %v3881_v51  ;;  %1040 = vmatmul.bf16.vlgmr.msra.gmra.mxu3 %v3883_v52  ;;  %v2920_v31 = vor.u32 %v3578_v17, %v2917_v18  ;;  %v2965_v17 = vld [vmem:[#allocation2 + $0x414] sm:$0xf0]  ;;  %v3626_v18 = vld [vmem:[#allocation2 + $0x52c] sm:$0xf] }
  0xc1   :  { %1053 = vmatmul.bf16.vlgmr.msrb.gmra.mxu0 %v3873_v11  ;;  %1066 = vmatmul.bf16.vlgmr.msrb.gmra.mxu1 %v3875_v12  ;;  %v3570_v11 = vld [vmem:[#allocation2 + $0x368] sm:$0xf0] }
  0xc2   :  { %1767 = vmatpush.bf16.msra.mxu0 %v2916_v38  ;;  %1780 = vmatpush.bf16.msra.mxu1 %v3012_v39  ;;  %v3594_v12 = vld [vmem:[#allocation2 + $0x428] sm:$0xf0]  ;;  %v2880_v29 = vor.u32 %v3570_v11, %v2879_v7  ;;  %v2964_v38 = vor.u32 %v3591_v25, %v2963_v24  ;;  %v2855_v39 = vld [vmem:[#allocation2 + $0x330] sm:$0xf]  ;;  %v2844_v7 = vor.u32 %v3561_v59, %v2843_v58  ;;  %v64_v24 = vperm.slane %v3869_v53, 6 }
  0xc3   :  { %1075 = vmatpush.bf16.msrb.mxu2 %v2683_v46  ;;  %1088 = vmatpush.bf16.msrb.mxu3 %v2779_v47  ;;  %v2976_v20 = vor.u32 %v3594_v12, %v2975_v8  ;;  %v3624_v46 = vld [vmem:[#allocation2 + $0x518] sm:$0xf0]  ;;  %v3191_v47 = vld [vmem:[#allocation2 + $0x5d0] sm:$0xf]  ;;  %v2856_v56 = vor.u32 %v3564_v40, %v2855_v39  ;;  %v2831_v8 = vld [vmem:[#allocation2 + $0x300] sm:$0xf] }
  0xc4   :  { %v3096_v60 = vor.u32 %v3624_v46, %v3095_v45  ;;  %v3558_v12 = vld [vmem:[#allocation2 + $0x308] sm:$0xf0]  ;;  %v65_v25 = vperm.slane %v3869_v53, 7  ;;  %v251_v53 = vadd.f32 %v3893_v61, %v64_v24  ;;  %v3612_v45 = vld [vmem:[#allocation2 + $0x4b8] sm:$0xf0] }
  0xc5   :  { %v2832_v22 = vor.u32 %v3558_v12, %v2831_v8  ;;  %v3035_v59 = vld [vmem:[#allocation2 + $0x498] sm:$0xf]  ;;  %v3023_v12 = vld [vmem:[#allocation2 + $0x480] sm:$0xf] }
  0xc6   :  { %1768 = vmatpush.bf16.msra.mxu0 %v2904_v50  ;;  %1781 = vmatpush.bf16.msra.mxu1 %v3000_v54  ;;  %v239_v50 = vpop.f32.mrf.mxu1  ;;  %v271_v54 = vmax.f32 %v225_v35, 0.0  ;;  %v3575_v35 = vld [vmem:[#allocation2 + $0x394] sm:$0xf]  ;;  %v273_v61 = vmax.f32 %v251_v53, 0.0  ;;  %v3193_v53 = vld [vmem:[#allocation2 + $0x5dc] sm:$0xf0] }
  0xc7   :  { %1076 = vmatpush.bf16.msrb.mxu2 %v2671_v63  ;;  %1089 = vmatpush.bf16.msrb.mxu3 %v2767_v0  ;;  %v3192_v63 = vor.u32 %v3648_v48, %v3191_v47  ;;  %v2939_v0 = vld [vmem:[#allocation2 + $0x3d8] sm:$0xf]  ;;  %v2908_v46 = vor.u32 %v3575_v35, %v2905_v36  ;;  %v3143_v48 = vld [vmem:[#allocation2 + $0x570] sm:$0xf]  ;;  %v3572_v50 = vld [vmem:[#allocation2 + $0x37c] sm:$0xf] }
  0xc8   :  { %v277_v6 = vpack.c.bf16 %v272_v55, %v271_v54  ;;  %v2940_v11 = vor.u32 %v3585_v1, %v2939_v0  ;;  %v2893_v54 = vld [vmem:[#allocation2 + $0x384] sm:$0xf0]  ;;  %v3596_v55 = vld [vmem:[#allocation2 + $0x43c] sm:$0xf]  ;;  %v3144_v58 = vor.u32 %v3636_v49, %v3143_v48  ;;  %v3131_v1 = vld [vmem:[#allocation2 + $0x558] sm:$0xf] }
  0xc9   :  { %v2941_v48 = vld [vmem:[#allocation2 + $0x3e4] sm:$0xf0]  ;;  %v3620_v49 = vld [vmem:[#allocation2 + $0x4fc] sm:$0xf] }
  0xca   :  { %1769 = vmatpush.bf16.msra.mxu0 %v2892_v3  ;;  %1782 = vmatpush.bf16.msra.mxu1 %v2988_v4  ;;  %v3621_v3 = vld [vmem:[#allocation2 + $0x500] sm:$0xf0]  ;;  %v3179_v4 = vld [vmem:[#allocation2 + $0x5b8] sm:$0xf]  ;;  %v1244_v21 = vunpack.c.h.b16 %v277_v6 }
  0xcb   :  { %1077 = vmatpush.bf16.msrb.mxu2 %v2659_v14  ;;  %1090 = vmatpush.bf16.msrb.mxu3 %v2755_v15  ;;  %v3084_v10 = vor.u32 %v3621_v3, %v3083_v2  ;;  %v3180_v13 = vor.u32 %v3645_v5, %v3179_v4  ;;  %v3582_v14 = vld [vmem:[#allocation2 + $0x3c8] sm:$0xf0]  ;;  %v3071_v15 = vld [vmem:[#allocation2 + $0x4e0] sm:$0xf]  ;;  %v3633_v2 = vld [vmem:[#allocation2 + $0x560] sm:$0xf0] }
  0xcc   :  { %v2928_v23 = vor.u32 %v3582_v14, %v2927_v9  ;;  %v3905_v40 = vpack.c.b16 %v1244_v21, %v1244_v21  ;;  %v3569_v3 = vld [vmem:[#allocation2 + $0x364] sm:$0xf]  ;;  %v2881_v4 = vld [vmem:[#allocation2 + $0x36c] sm:$0xf0]  ;;  %v3132_v8 = vor.u32 %v3633_v2, %v3131_v1  ;;  %v3606_v9 = vld [vmem:[#allocation2 + $0x488] sm:$0xf0] }
  0xcd   :  { %v3593_v5 = vld [vmem:[#allocation2 + $0x424] sm:$0xf]  ;;  %v3650_v21 = vld [vmem:[#allocation2 + $0x5ec] sm:$0xf]  ;;  %v3073_v1 = vld [vmem:[#allocation2 + $0x4ec] sm:$0xf0] }
  0xce   :  { %1770 = vmatpush.bf16.msra.mxu0 %v2880_v29  ;;  %1783 = vmatpush.bf16.msra.mxu1 %v2976_v20  ;;  %v3013_v29 = vld [vmem:[#allocation2 + $0x474] sm:$0xf0]  ;;  %v1243_v20 = vunpack.c.l.b16 %v277_v6  ;;  %v2977_v6 = vld [vmem:[#allocation2 + $0x42c] sm:$0xf0]  ;;  %v3641_v2 = vld [vmem:[#allocation2 + $0x5a4] sm:$0xf] }
  0xcf   :  { %1078 = vmatpush.bf16.msrb.mxu2 %v2647_v27  ;;  %1091 = vmatpush.bf16.msrb.mxu3 %v2743_v34  ;;  %v3016_v32 = vor.u32 %v3602_v19, %v3013_v29  ;;  %v3639_v34 = vld [vmem:[#allocation2 + $0x590] sm:$0xf0]  ;;  %v2980_v14 = vor.u32 %v3593_v5, %v2977_v6  ;;  %v3580_v5 = vld [vmem:[#allocation2 + $0x3b8] sm:$0xf0]  ;;  %v3019_v6 = vld [vmem:[#allocation2 + $0x470] sm:$0xf] }
  0xd0   :  { %v3903_v39 = vpack.c.b16 %v1243_v20, %v1243_v20  ;;  %v3156_v43 = vor.u32 %v3639_v34, %v3155_v33  ;;  %v3109_v20 = vld [vmem:[#allocation2 + $0x534] sm:$0xf0]  ;;  %v2953_v33 = vld [vmem:[#allocation2 + $0x3fc] sm:$0xf0]  ;;  %v3623_v34 = vld [vmem:[#allocation2 + $0x514] sm:$0xf] }
  0xd2   :  { %1771 = vmatpush.bf16.msra.mxu0 %v2868_v37  ;;  %1784 = vmatpush.bf16.msra.mxu1 %v2964_v38  ;;  %v3599_v37 = vld [vmem:[#allocation2 + $0x454] sm:$0xf]  ;;  %v3001_v38 = vld [vmem:[#allocation2 + $0x45c] sm:$0xf0] }
  0xd3   :  { %1793 = vmatpush.bf16.msra.mxu2 %v3108_v41  ;;  %1806 = vmatpush.bf16.msra.mxu3 %v3204_v42  ;;  %v264_v41 = vadd.f32 %v3895_v62, %v65_v25  ;;  %v3060_v42 = vor.u32 %v3615_v30, %v3059_v28  ;;  %v3004_v47 = vor.u32 %v3599_v37, %v3001_v38  ;;  %v2857_v28 = vld [vmem:[#allocation2 + $0x33c] sm:$0xf0]  ;;  %v3647_v38 = vld [vmem:[#allocation2 + $0x5d4] sm:$0xf] }
  0xd4   :  { %1079 = vmatmul.bf16.vlgmr.msrb.gmra.mxu2 %v3881_v51  ;;  %1092 = vmatmul.bf16.vlgmr.msrb.gmra.mxu3 %v3883_v52  ;;  %v3618_v51 = vld [vmem:[#allocation2 + $0x4e8] sm:$0xf0]  ;;  %v3112_v30 = vor.u32 %v3626_v18, %v3109_v20  ;;  %v3097_v37 = vld [vmem:[#allocation2 + $0x51c] sm:$0xf0]  ;;  %v3007_v18 = vld [vmem:[#allocation2 + $0x458] sm:$0xf] }
  0xd5   :  { %v3642_v52 = vld [vmem:[#allocation2 + $0x5a8] sm:$0xf0]  ;;  %v3072_v26 = vor.u32 %v3618_v51, %v3071_v15  ;;  %v274_v62 = vmax.f32 %v264_v41, 0.0 }
  0xd6   :  { %1772 = vmatpush.bf16.msra.mxu0 %v2856_v56  ;;  %1785 = vmatpush.bf16.msra.mxu1 %v2952_v57  ;;  %v3168_v27 = vor.u32 %v3642_v52, %v3167_v16  ;;  %v2989_v56 = vld [vmem:[#allocation2 + $0x444] sm:$0xf0]  ;;  %v3048_v57 = vor.u32 %v3612_v45, %v3047_v44  ;;  %v3630_v15 = vld [vmem:[#allocation2 + $0x548] sm:$0xf0]  ;;  %v2869_v16 = vld [vmem:[#allocation2 + $0x354] sm:$0xf0]  ;;  %v3100_v45 = vor.u32 %v3623_v34, %v3097_v37 }
  0xd7   :  { %1794 = vmatpush.bf16.msra.mxu2 %v3096_v60  ;;  %1807 = vmatpush.bf16.msra.mxu3 %v3192_v63  ;;  %v3609_v60 = vld [vmem:[#allocation2 + $0x4a0] sm:$0xf0]  ;;  %v2896_v63 = vor.u32 %v3572_v50, %v2893_v54  ;;  %v2992_v0 = vor.u32 %v3596_v55, %v2989_v56  ;;  %v3566_v51 = vld [vmem:[#allocation2 + $0x34c] sm:$0xf]  ;;  %v2845_v44 = vld [vmem:[#allocation2 + $0x324] sm:$0xf0] }
  0xd8   :  { %v3590_v52 = vld [vmem:[#allocation2 + $0x40c] sm:$0xf]  ;;  %v2872_v25 = vor.u32 %v3566_v51, %v2869_v16  ;;  %v3085_v50 = vld [vmem:[#allocation2 + $0x504] sm:$0xf0]  ;;  %v3644_v54 = vld [vmem:[#allocation2 + $0x5bc] sm:$0xf] }
  0xd9   :  { %v3181_v55 = vld [vmem:[#allocation2 + $0x5c4] sm:$0xf0]  ;;  %v3638_v51 = vld [vmem:[#allocation2 + $0x58c] sm:$0xf]  ;;  %v3157_v16 = vld [vmem:[#allocation2 + $0x594] sm:$0xf0] }
  0xda   :  { %1773 = vmatpush.bf16.msra.mxu0 %v2844_v7  ;;  %1786 = vmatpush.bf16.msra.mxu1 %v2940_v11  ;;  %v278_v7 = vpack.c.bf16 %v274_v62, %v273_v61  ;;  %v3036_v11 = vor.u32 %v3609_v60, %v3035_v59  ;;  %v3557_v62 = vld [vmem:[#allocation2 + $0x304] sm:$0xf]  ;;  %v3088_v59 = vor.u32 %v3620_v49, %v3085_v50  ;;  %v3608_v34 = vld [vmem:[#allocation2 + $0x49c] sm:$0xf]  ;;  %v3037_v37 = vld [vmem:[#allocation2 + $0x4a4] sm:$0xf0] }
  0xdb   :  { %1795 = vmatpush.bf16.msra.mxu2 %v3084_v10  ;;  %1808 = vmatpush.bf16.msra.mxu3 %v3180_v13  ;;  %v3119_v10 = vld [vmem:[#allocation2 + $0x540] sm:$0xf]  ;;  %v2884_v13 = vor.u32 %v3569_v3, %v2881_v4  ;;  %v3184_v60 = vor.u32 %v3644_v54, %v3181_v55  ;;  %v3169_v3 = vld [vmem:[#allocation2 + $0x5ac] sm:$0xf0]  ;;  %v3160_v20 = vor.u32 %v3638_v51, %v3157_v16  ;;  %v3605_v49 = vld [vmem:[#allocation2 + $0x484] sm:$0xf] }
  0xdc   :  { %v1245_v19 = vunpack.c.l.b16 %v278_v7  ;;  %v1246_v29 = vunpack.c.h.b16 %v278_v7  ;;  %v3120_v24 = vor.u32 %v3630_v15, %v3119_v10  ;;  %v2923_v4 = vld [vmem:[#allocation2 + $0x3b0] sm:$0xf]  ;;  %v3604_v7 = vld [vmem:[#allocation2 + $0x478] sm:$0xf0]  ;;  %v3614_v10 = vld [vmem:[#allocation2 + $0x4cc] sm:$0xf] }
  0xdd   :  { %v3020_v15 = vor.u32 %v3604_v7, %v3019_v6  ;;  %v3025_v50 = vld [vmem:[#allocation2 + $0x48c] sm:$0xf0]  ;;  %v3629_v54 = vld [vmem:[#allocation2 + $0x544] sm:$0xf]  ;;  %v2863_v6 = vld [vmem:[#allocation2 + $0x338] sm:$0xf] }
  0xde   :  { %1774 = vmatpush.bf16.msra.mxu0 %v2832_v22  ;;  %1787 = vmatpush.bf16.msra.mxu1 %v2928_v23  ;;  %v3205_v22 = vld [vmem:[#allocation2 + $0x5f4] sm:$0xf0]  ;;  %v3024_v23 = vor.u32 %v3606_v9, %v3023_v12  ;;  %v3911_v35 = vpack.c.b16 %v1245_v19, %v1245_v19  ;;  %v3913_v36 = vpack.c.b16 %v1246_v29, %v1246_v29  ;;  %v3601_v19 = vld [vmem:[#allocation2 + $0x460] sm:$0xf0] }
  0xdf   :  { %1796 = vmatpush.bf16.msra.mxu2 %v3072_v26  ;;  %1809 = vmatpush.bf16.msra.mxu3 %v3168_v27  ;;  %v2968_v26 = vor.u32 %v3590_v52, %v2965_v17  ;;  %v3563_v27 = vld [vmem:[#allocation2 + $0x334] sm:$0xf]  ;;  %v3172_v9 = vor.u32 %v3641_v2, %v3169_v3  ;;  %v2911_v52 = vld [vmem:[#allocation2 + $0x398] sm:$0xf]  ;;  %v3577_v17 = vld [vmem:[#allocation2 + $0x3a0] sm:$0xf0]  ;;  %v3028_v2 = vor.u32 %v3605_v49, %v3025_v50 }
  0xe0   :  { %v2860_v41 = vor.u32 %v3563_v27, %v2857_v28  ;;  %v2899_v27 = vld [vmem:[#allocation2 + $0x380] sm:$0xf]  ;;  %v3574_v28 = vld [vmem:[#allocation2 + $0x388] sm:$0xf0]  ;;  %v3565_v7 = vld [vmem:[#allocation2 + $0x340] sm:$0xf0] }
  0xe1   :  { %1775 = vmatmul.bf16.vlgmr.msra.gmra.mxu0 %v3903_v39  ;;  %1788 = vmatmul.bf16.vlgmr.msra.gmra.mxu1 %v3905_v40  ;;  %v2864_v51 = vor.u32 %v3565_v7, %v2863_v6  ;;  %v3127_v6 = vld [vmem:[#allocation2 + $0x548] sm:$0xf] }
  0xe2   :  { %1819 = vmatpush.bf16.msrb.mxu0 %v2920_v31  ;;  %1832 = vmatpush.bf16.msrb.mxu1 %v3016_v32  ;;  %v3208_v31 = vor.u32 %v3650_v21, %v3205_v22  ;;  %v3587_v32 = vld [vmem:[#allocation2 + $0x3f4] sm:$0xf]  ;;  %v3049_v22 = vld [vmem:[#allocation2 + $0x4bc] sm:$0xf0] }
  0xe3   :  { %1797 = vmatpush.bf16.msra.mxu2 %v3060_v42  ;;  %1810 = vmatpush.bf16.msra.mxu3 %v3156_v43  ;;  %v2956_v42 = vor.u32 %v3587_v32, %v2953_v33  ;;  %v3560_v43 = vld [vmem:[#allocation2 + $0x31c] sm:$0xf]  ;;  %v3611_v21 = vld [vmem:[#allocation2 + $0x4b4] sm:$0xf] }
  0xe4   :  { %v2848_v56 = vor.u32 %v3560_v43, %v2845_v44  ;;  %v3052_v32 = vor.u32 %v3611_v21, %v3049_v22  ;;  %v2887_v43 = vld [vmem:[#allocation2 + $0x368] sm:$0xf]  ;;  %v3571_v44 = vld [vmem:[#allocation2 + $0x370] sm:$0xf0]  ;;  %v3091_v21 = vld [vmem:[#allocation2 + $0x500] sm:$0xf] }
  0xe5   :  { %v2888_v55 = vor.u32 %v3571_v44, %v2887_v43  ;;  %v3622_v22 = vld [vmem:[#allocation2 + $0x508] sm:$0xf0] }
  0xe6   :  { %1820 = vmatpush.bf16.msrb.mxu0 %v2908_v46  ;;  %1833 = vmatpush.bf16.msrb.mxu1 %v3004_v47  ;;  %v3196_v46 = vor.u32 %v3647_v38, %v3193_v53  ;;  %v3584_v47 = vld [vmem:[#allocation2 + $0x3dc] sm:$0xf]  ;;  %v2900_v38 = vor.u32 %v3574_v28, %v2899_v27  ;;  %v2839_v27 = vld [vmem:[#allocation2 + $0x308] sm:$0xf]  ;;  %v3559_v28 = vld [vmem:[#allocation2 + $0x310] sm:$0xf0] }
  0xe7   :  { %1798 = vmatpush.bf16.msra.mxu2 %v3048_v57  ;;  %1811 = vmatpush.bf16.msra.mxu3 %v3144_v58  ;;  %v2944_v61 = vor.u32 %v3584_v47, %v2941_v48  ;;  %v2833_v57 = vld [vmem:[#allocation2 + $0x30c] sm:$0xf0]  ;;  %v3581_v58 = vld [vmem:[#allocation2 + $0x3c4] sm:$0xf]  ;;  %v3040_v47 = vor.u32 %v3608_v34, %v3037_v37  ;;  %v3079_v34 = vld [vmem:[#allocation2 + $0x4e8] sm:$0xf] }
  0xe8   :  { %v3619_v37 = vld [vmem:[#allocation2 + $0x4f0] sm:$0xf0] }
  0xe9   :  { %v3080_v43 = vor.u32 %v3619_v37, %v3079_v34  ;;  %v3680_v34 = vld [vmem:[%s4097_s5 + $0xd8] sm:$0xff] }
  0xea   :  { %1821 = vmatpush.bf16.msrb.mxu0 %v2896_v63  ;;  %1834 = vmatpush.bf16.msrb.mxu1 %v2992_v0  ;;  %v2929_v63 = vld [vmem:[#allocation2 + $0x3cc] sm:$0xf0]  ;;  %v3617_v0 = vld [vmem:[#allocation2 + $0x4e4] sm:$0xf]  ;;  %v3692_v37 = vld [vmem:[%s4097_s5 + $0x138] sm:$0xff] }
  0xeb   :  { %1799 = vmatpush.bf16.msra.mxu2 %v3036_v11  ;;  %1812 = vmatpush.bf16.msra.mxu3 %v3132_v8  ;;  %v2836_v11 = vor.u32 %v3557_v62, %v2833_v57  ;;  %v2932_v8 = vor.u32 %v3581_v58, %v2929_v63  ;;  %v3076_v12 = vor.u32 %v3617_v0, %v3073_v1  ;;  %v2875_v62 = vld [vmem:[#allocation2 + $0x350] sm:$0xf]  ;;  %v3568_v57 = vld [vmem:[#allocation2 + $0x358] sm:$0xf0] }
  0xec   :  { %v2971_v58 = vld [vmem:[#allocation2 + $0x410] sm:$0xf]  ;;  %v3628_v63 = vld [vmem:[#allocation2 + $0x538] sm:$0xf0] }
  0xed   :  { %v3211_v0 = vld [vmem:[#allocation2 + $0x5f0] sm:$0xf]  ;;  %v3652_v1 = vld [vmem:[#allocation2 + $0x5f8] sm:$0xf0] }
  0xee   :  { %1822 = vmatpush.bf16.msrb.mxu0 %v2884_v13  ;;  %1835 = vmatpush.bf16.msrb.mxu1 %v2980_v14  ;;  %v3061_v13 = vld [vmem:[#allocation2 + $0x4d4] sm:$0xf0]  ;;  %v2924_v14 = vor.u32 %v3580_v5, %v2923_v4  ;;  %v2876_v4 = vor.u32 %v3568_v57, %v2875_v62 }
  0xef   :  { %1800 = vmatpush.bf16.msra.mxu2 %v3024_v23  ;;  %1813 = vmatpush.bf16.msra.mxu3 %v3120_v24  ;;  %v3064_v29 = vor.u32 %v3614_v10, %v3061_v13  ;;  %v2912_v23 = vor.u32 %v3577_v17, %v2911_v52  ;;  %v3008_v24 = vor.u32 %v3601_v19, %v3007_v18  ;;  %v3103_v10 = vld [vmem:[#allocation2 + $0x518] sm:$0xf]  ;;  %v3625_v13 = vld [vmem:[#allocation2 + $0x520] sm:$0xf0]  ;;  %v2851_v52 = vld [vmem:[#allocation2 + $0x320] sm:$0xf] }
  0xf0   :  { %v3562_v17 = vld [vmem:[#allocation2 + $0x328] sm:$0xf0]  ;;  %v3104_v18 = vor.u32 %v3625_v13, %v3103_v10  ;;  %v3659_v10 = vld [vmem:[%s4097_s5 + $0x30] sm:$0xff] }
  0xf2   :  { %1823 = vmatpush.bf16.msrb.mxu0 %v2872_v25  ;;  %1836 = vmatpush.bf16.msrb.mxu1 %v2968_v26  ;;  %v3635_v25 = vld [vmem:[#allocation2 + $0x574] sm:$0xf]  ;;  %v3145_v26 = vld [vmem:[#allocation2 + $0x57c] sm:$0xf0] }
  0xf3   :  { %1845 = vmatpush.bf16.msrb.mxu2 %v3112_v30  ;;  %1858 = vmatpush.bf16.msrb.mxu3 %v3208_v31  ;;  %v2995_v30 = vld [vmem:[#allocation2 + $0x440] sm:$0xf]  ;;  %v3598_v31 = vld [vmem:[#allocation2 + $0x448] sm:$0xf0]  ;;  %v3148_v33 = vor.u32 %v3635_v25, %v3145_v26  ;;  %v2852_v25 = vor.u32 %v3562_v17, %v2851_v52  ;;  %v3683_v52 = vld [vmem:[%s4097_s5 + $0xf0] sm:$0xff] }
  0xf4   :  { %1801 = vmatmul.bf16.vlgmr.msra.gmra.mxu2 %v3911_v35  ;;  %1814 = vmatmul.bf16.vlgmr.msra.gmra.mxu3 %v3913_v36  ;;  %v2996_v53 = vor.u32 %v3598_v31, %v2995_v30  ;;  %v3092_v30 = vor.u32 %v3622_v22, %v3091_v21  ;;  %v3656_v21 = vld [vmem:[%s4097_s5 + $0x18] sm:$0xff] }
  0xf6   :  { %1824 = vmatpush.bf16.msrb.mxu0 %v2860_v41  ;;  %1837 = vmatpush.bf16.msrb.mxu1 %v2956_v42  ;;  %v3632_v41 = vld [vmem:[#allocation2 + $0x55c] sm:$0xf]  ;;  %v3133_v42 = vld [vmem:[#allocation2 + $0x564] sm:$0xf0] }
  0xf7   :  { %1846 = vmatpush.bf16.msrb.mxu2 %v3100_v45  ;;  %1859 = vmatpush.bf16.msrb.mxu3 %v3196_v46  ;;  %v2983_v45 = vld [vmem:[#allocation2 + $0x428] sm:$0xf]  ;;  %v3595_v46 = vld [vmem:[#allocation2 + $0x430] sm:$0xf0]  ;;  %v3136_v48 = vor.u32 %v3632_v41, %v3133_v42  ;;  %v2840_v41 = vor.u32 %v3559_v28, %v2839_v27 }
  0xfa   :  { %1825 = vmatpush.bf16.msrb.mxu0 %v2848_v56  ;;  %1838 = vmatpush.bf16.msrb.mxu1 %v2944_v61  ;;  %v2984_v56 = vor.u32 %v3595_v46, %v2983_v45  ;;  %v3121_v61 = vld [vmem:[#allocation2 + $0x54c] sm:$0xf0]  ;;  %v3616_v46 = vld [vmem:[#allocation2 + $0x4d8] sm:$0xf0] }
  0xfb   :  { %1847 = vmatpush.bf16.msrb.mxu2 %v3088_v59  ;;  %1860 = vmatpush.bf16.msrb.mxu3 %v3184_v60  ;;  %v3592_v59 = vld [vmem:[#allocation2 + $0x418] sm:$0xf0]  ;;  %v3115_v60 = vld [vmem:[#allocation2 + $0x530] sm:$0xf]  ;;  %v3124_v3 = vor.u32 %v3629_v54, %v3121_v61  ;;  %v3055_v54 = vld [vmem:[#allocation2 + $0x4b8] sm:$0xf] }
  0xfc   :  { %v2972_v5 = vor.u32 %v3592_v59, %v2971_v58  ;;  %v3067_v45 = vld [vmem:[#allocation2 + $0x4d0] sm:$0xf]  ;;  %v3637_v61 = vld [vmem:[#allocation2 + $0x580] sm:$0xf0] }
  0xfd   :  { %v3068_v49 = vor.u32 %v3616_v46, %v3067_v45  ;;  %v3653_v45 = vld [vmem:[%s4097_s5] sm:$0xff]  ;;  %v3679_v46 = vld [vmem:[%s4097_s5 + $0xd0] sm:$0xff] }
  0xfe   :  { %1826 = vmatpush.bf16.msrb.mxu0 %v2836_v11  ;;  %1839 = vmatpush.bf16.msrb.mxu1 %v2932_v8  ;;  %v3116_v11 = vor.u32 %v3628_v63, %v3115_v60  ;;  %v3212_v8 = vor.u32 %v3652_v1, %v3211_v0  ;;  %v3043_v60 = vld [vmem:[#allocation2 + $0x4a0] sm:$0xf]  ;;  %v3610_v63 = vld [vmem:[#allocation2 + $0x4a8] sm:$0xf0] }
  0xff   :  { %1848 = vmatpush.bf16.msrb.mxu2 %v3076_v12  ;;  %1861 = vmatpush.bf16.msrb.mxu3 %v3172_v9  ;;  %v2959_v12 = vld [vmem:[#allocation2 + $0x3f8] sm:$0xf]  ;;  %v3589_v9 = vld [vmem:[#allocation2 + $0x400] sm:$0xf0]  ;;  %v3139_v0 = vld [vmem:[#allocation2 + $0x560] sm:$0xf] }
 0x100   :  { %v2960_v16 = vor.u32 %v3589_v9, %v2959_v12  ;;  %v3634_v1 = vld [vmem:[#allocation2 + $0x568] sm:$0xf0]  ;;  %v3660_v12 = vld [vmem:[%s4097_s5 + $0x38] sm:$0xff]  ;;  %v407_v9 = vld [vmem:[%s4096_s4] sm:$0x7] }
 0x101   :  { %1827 = vmatmul.bf16.vlgmr.msrb.gmra.mxu0 %v3903_v39  ;;  %1840 = vmatmul.bf16.vlgmr.msrb.gmra.mxu1 %v3905_v40  ;;  %v410_v13 = vperm.slane %v407_v9, 1 }
 0x102   :  { %1871 = vmatpush.bf16.msra.mxu0 %v2924_v14  ;;  %1884 = vmatpush.bf16.msra.mxu1 %v3020_v15  ;;  %v3199_v14 = vld [vmem:[#allocation2 + $0x5d8] sm:$0xf]  ;;  %v3649_v15 = vld [vmem:[#allocation2 + $0x5e0] sm:$0xf0] }
 0x103   :  { %1849 = vmatpush.bf16.msrb.mxu2 %v3064_v29  ;;  %1862 = vmatpush.bf16.msrb.mxu3 %v3160_v20  ;;  %v3200_v19 = vor.u32 %v3649_v15, %v3199_v14  ;;  %v2947_v29 = vld [vmem:[#allocation2 + $0x3e0] sm:$0xf]  ;;  %v3586_v20 = vld [vmem:[#allocation2 + $0x3e8] sm:$0xf0]  ;;  %v3684_v14 = vld [vmem:[%s4097_s5 + $0xf8] sm:$0xff] }
 0x104   :  { %v2948_v26 = vor.u32 %v3586_v20, %v2947_v29  ;;  %v3658_v15 = vld [vmem:[%s4097_s5 + $0x28] sm:$0xff] }
 0x106   :  { %1872 = vmatpush.bf16.msra.mxu0 %v2912_v23  ;;  %1885 = vmatpush.bf16.msra.mxu1 %v3008_v24  ;;  %v3187_v23 = vld [vmem:[#allocation2 + $0x5c0] sm:$0xf]  ;;  %v3646_v24 = vld [vmem:[#allocation2 + $0x5c8] sm:$0xf0] }
 0x107   :  { %1850 = vmatpush.bf16.msrb.mxu2 %v3052_v32  ;;  %1863 = vmatpush.bf16.msrb.mxu3 %v3148_v33  ;;  %v3188_v31 = vor.u32 %v3646_v24, %v3187_v23  ;;  %v2935_v32 = vld [vmem:[#allocation2 + $0x3c8] sm:$0xf]  ;;  %v3583_v33 = vld [vmem:[#allocation2 + $0x3d0] sm:$0xf0] }
 0x108   :  { %v2936_v42 = vor.u32 %v3583_v33, %v2935_v32  ;;  %v3682_v24 = vld [vmem:[%s4097_s5 + $0xe8] sm:$0xff]  ;;  %v3681_v32 = vld [vmem:[%s4097_s5 + $0xe0] sm:$0xff] }
 0x109   :  { %v3654_v33 = vld [vmem:[%s4097_s5 + $0x8] sm:$0xff] }
 0x10a   :  { %1873 = vmatpush.bf16.msra.mxu0 %v2900_v38  ;;  %1886 = vmatpush.bf16.msra.mxu1 %v2996_v53  ;;  %v3175_v38 = vld [vmem:[#allocation2 + $0x5a8] sm:$0xf]  ;;  %v3643_v53 = vld [vmem:[#allocation2 + $0x5b0] sm:$0xf0] }
 0x10b   :  { %1851 = vmatpush.bf16.msrb.mxu2 %v3040_v47  ;;  %1864 = vmatpush.bf16.msrb.mxu3 %v3136_v48  ;;  %v3176_v44 = vor.u32 %v3643_v53, %v3175_v38  ;;  %v3163_v47 = vld [vmem:[#allocation2 + $0x590] sm:$0xf]  ;;  %v3640_v48 = vld [vmem:[#allocation2 + $0x598] sm:$0xf0] }
 0x10c   :  { %v3164_v50 = vor.u32 %v3640_v48, %v3163_v47 }
 0x10e   :  { %1874 = vmatpush.bf16.msra.mxu0 %v2888_v55  ;;  %1887 = vmatpush.bf16.msra.mxu1 %v2984_v56  ;;  %v3613_v55 = vld [vmem:[#allocation2 + $0x4c0] sm:$0xf0]  ;;  %v3151_v56 = vld [vmem:[#allocation2 + $0x578] sm:$0xf] }
 0x10f   :  { %1852 = vmatpush.bf16.msrb.mxu2 %v3028_v2  ;;  %1865 = vmatpush.bf16.msrb.mxu3 %v3124_v3  ;;  %v3056_v62 = vor.u32 %v3613_v55, %v3055_v54  ;;  %v3152_v57 = vor.u32 %v3637_v61, %v3151_v56  ;;  %v3044_v2 = vor.u32 %v3610_v63, %v3043_v60  ;;  %v3678_v54 = vld [vmem:[%s4097_s5 + $0xc8] sm:$0xff]  ;;  %v3667_v63 = vld [vmem:[%s4097_s5 + $0x70] sm:$0xff] }
 0x110   :  { %v3140_v3 = vor.u32 %v3634_v1, %v3139_v0 }
 0x112   :  { %1875 = vmatpush.bf16.msra.mxu0 %v2876_v4  ;;  %1888 = vmatpush.bf16.msra.mxu1 %v2972_v5  ;;  %v3031_v4 = vld [vmem:[#allocation2 + $0x488] sm:$0xf]  ;;  %v3607_v5 = vld [vmem:[#allocation2 + $0x490] sm:$0xf0] }
 0x113   :  { %1897 = vmatpush.bf16.msra.mxu2 %v3116_v11  ;;  %1910 = vmatpush.bf16.msra.mxu3 %v3212_v8 }
 0x114   :  { %1853 = vmatmul.bf16.vlgmr.msrb.gmra.mxu2 %v3911_v35  ;;  %1866 = vmatmul.bf16.vlgmr.msrb.gmra.mxu3 %v3913_v36 }
 0x116   :  { %1876 = vmatpush.bf16.msra.mxu0 %v2864_v51  ;;  %1889 = vmatpush.bf16.msra.mxu1 %v2960_v16 }
 0x117   :  { %1898 = vmatpush.bf16.msra.mxu2 %v3104_v18  ;;  %1911 = vmatpush.bf16.msra.mxu3 %v3200_v19 }
 0x11a   :  { %1877 = vmatpush.bf16.msra.mxu0 %v2852_v25  ;;  %1890 = vmatpush.bf16.msra.mxu1 %v2948_v26  ;;  %v3655_v26 = vld [vmem:[%s4097_s5 + $0x10] sm:$0xff] }
 0x11b   :  { %1899 = vmatpush.bf16.msra.mxu2 %v3092_v30  ;;  %1912 = vmatpush.bf16.msra.mxu3 %v3188_v31  ;;  %v411_v31 = vperm.slane %v407_v9, 2 }
 0x11d   :  { %v950_v58 = vpop.f32.mrf.mxu0  ;;  %v963_v59 = vpop.f32.mrf.mxu1 }
 0x11e   :  { %1878 = vmatpush.bf16.msra.mxu0 %v2840_v41  ;;  %1891 = vmatpush.bf16.msra.mxu1 %v2936_v42 }
 0x11f   :  { %1900 = vmatpush.bf16.msra.mxu2 %v3080_v43  ;;  %1913 = vmatpush.bf16.msra.mxu3 %v3176_v44  ;;  %v3691_v43 = vld [vmem:[%s4097_s5 + $0x130] sm:$0xff] }
 0x121   :  { %1879 = vmatmul.bf16.vlgmr.msra.gmra.mxu0 %v3903_v39  ;;  %1892 = vmatmul.bf16.vlgmr.msra.gmra.mxu1 %v3905_v40  ;;  %v3631_v39 = vld [vmem:[#allocation2 + $0x550] sm:$0xf0]  ;;  %v3032_v40 = vor.u32 %v3607_v5, %v3031_v4 }
 0x122   :  { %v3128_v7 = vor.u32 %v3631_v39, %v3127_v6  ;;  %2170 = vmatpush.bf16.msrb.mxu0 %v3684_v14  ;;  %2183 = vmatpush.bf16.msrb.mxu1 %v3692_v37  ;;  %v3689_v6 = vld [vmem:[%s4097_s5 + $0x120] sm:$0xff]  ;;  %v3686_v14 = vld [vmem:[%s4097_s5 + $0x108] sm:$0xff] }
 0x123   :  { %1901 = vmatpush.bf16.msra.mxu2 %v3068_v49  ;;  %1914 = vmatpush.bf16.msra.mxu3 %v3164_v50  ;;  %v3665_v39 = vld [vmem:[%s4097_s5 + $0x60] sm:$0xff] }
 0x125   :  { %v952_v11 = vpop.f32.mrf.mxu0  ;;  %v965_v8 = vpop.f32.mrf.mxu1 }
 0x126   :  { %2171 = vmatpush.bf16.msrb.mxu0 %v3683_v52  ;;  %2184 = vmatpush.bf16.msrb.mxu1 %v3691_v43  ;;  %v3688_v11 = vld [vmem:[%s4097_s5 + $0x118] sm:$0xff]  ;;  %v4025_v52 = vld [vmem:[%s4096_s4 + $0x3] sm:$0x7] }
 0x127   :  { %1902 = vmatpush.bf16.msra.mxu2 %v3056_v62  ;;  %1915 = vmatpush.bf16.msra.mxu3 %v3152_v57  ;;  %v3677_v57 = vld [vmem:[%s4097_s5 + $0xc0] sm:$0xff]  ;;  %v3664_v8 = vld [vmem:[%s4097_s5 + $0x58] sm:$0xff] }
 0x128   :  { %v3697_v43 = vld [vmem:[%s4097_s5 + $0x160] sm:$0xff] }
 0x12a   :  { %2172 = vmatpush.bf16.msrb.mxu0 %v3682_v24 }
 0x12b   :  { %1903 = vmatpush.bf16.msra.mxu2 %v3044_v2  ;;  %1916 = vmatpush.bf16.msra.mxu3 %v3140_v3  ;;  %v3690_v2 = vld [vmem:[%s4097_s5 + $0x128] sm:$0xff] }
 0x12c   :  { %v3666_v3 = vld [vmem:[%s4097_s5 + $0x68] sm:$0xff]  ;;  %2185 = vmatpush.bf16.msrb.mxu1 %v3690_v2 }
 0x12e   :  { %v1002_v51 = vpop.f32.mrf.mxu0  ;;  %v1015_v16 = vpop.f32.mrf.mxu1  ;;  %2173 = vmatpush.bf16.msrb.mxu0 %v3681_v32 }
 0x12f   :  { %1904 = vmatpush.bf16.msra.mxu2 %v3032_v40  ;;  %1917 = vmatpush.bf16.msra.mxu3 %v3128_v7  ;;  %v1003_v17 = vadd.f32 %v1002_v51, %v410_v13  ;;  %v3663_v13 = vld [vmem:[%s4097_s5 + $0x50] sm:$0xff] }
 0x130   :  { %2186 = vmatpush.bf16.msrb.mxu1 %v3689_v6 }
 0x131   :  { %v1016_v18 = vadd.f32 %v1015_v16, %v1003_v17  ;;  %v3685_v17 = vld [vmem:[%s4097_s5 + $0x100] sm:$0xff] }
 0x132   :  { %1905 = vmatmul.bf16.vlgmr.msra.gmra.mxu2 %v3911_v35  ;;  %1918 = vmatmul.bf16.vlgmr.msra.gmra.mxu3 %v3913_v36  ;;  %v409_v35 = vperm.slane %v407_v9, 0  ;;  %v3657_v36 = vld [vmem:[%s4097_s5 + $0x20] sm:$0xff] }
 0x133   :  { %2353 = vmatpush.bf16.msrb.mxu3 %v3660_v12  ;;  %v976_v19 = vpop.f32.mrf.mxu2  ;;  %v989_v29 = vpop.f32.mrf.mxu3  ;;  %2174 = vmatpush.bf16.msrb.mxu0 %v3680_v34 }
 0x134   :  { %v951_v20 = vadd.f32 %v950_v58, %v409_v35  ;;  %v3668_v58 = vld [vmem:[%s4097_s5 + $0x78] sm:$0xff]  ;;  %2187 = vmatpush.bf16.msrb.mxu1 %v3688_v11  ;;  %v3661_v35 = vld [vmem:[%s4097_s5 + $0x40] sm:$0xff] }
 0x136   :  { %v1004_v22 = vpop.f32.mrf.mxu0  ;;  %v1017_v23 = vpop.f32.mrf.mxu1  ;;  %v964_v25 = vadd.f32 %v963_v59, %v951_v20 }
 0x137   :  { %2354 = vmatpush.bf16.msrb.mxu3 %v3659_v10  ;;  %2175 = vmatpush.bf16.msrb.mxu0 %v3679_v46  ;;  %v3687_v10 = vld [vmem:[%s4097_s5 + $0x110] sm:$0xff]  ;;  %v3669_v46 = vld [vmem:[%s4097_s5 + $0x80] sm:$0xff] }
 0x138   :  { %v977_v27 = vadd.f32 %v976_v19, %v964_v25  ;;  %2188 = vmatpush.bf16.msrb.mxu1 %v3687_v10 }
 0x13a   :  { %v990_v38 = vadd.f32 %v989_v29, %v977_v27  ;;  %v3675_v29 = vld [vmem:[%s4097_s5 + $0xb0] sm:$0xff]  ;;  %v3700_v27 = vld [vmem:[%s4097_s5 + $0x178] sm:$0xff] }
 0x13b   :  { %2355 = vmatpush.bf16.msrb.mxu3 %v3658_v15  ;;  %v978_v28 = vpop.f32.mrf.mxu2  ;;  %v991_v30 = vpop.f32.mrf.mxu3  ;;  %2176 = vmatpush.bf16.msrb.mxu0 %v3678_v54  ;;  %v3662_v15 = vld [vmem:[%s4097_s5 + $0x48] sm:$0xff]  ;;  %v3695_v54 = vld [vmem:[%s4097_s5 + $0x150] sm:$0xff] }
 0x13c   :  { %v1097_v47 = vmax.f32 %v990_v38, 0.0  ;;  %2189 = vmatpush.bf16.msrb.mxu1 %v3686_v14  ;;  %2196 = vmatpush.bf16.msrb.mxu2 %v3700_v27  ;;  %v3699_v38 = vld [vmem:[%s4097_s5 + $0x170] sm:$0xff] }
 0x13e   :  { %v1054_v53 = vpop.f32.mrf.mxu0  ;;  %v1067_v41 = vpop.f32.mrf.mxu1  ;;  %v1100_v55 = vpack.c.bf16 %v1097_v47, %v1097_v47  ;;  %v3696_v47 = vld [vmem:[%s4097_s5 + $0x158] sm:$0xff] }
 0x13f   :  { %2356 = vmatpush.bf16.msrb.mxu3 %v3657_v36  ;;  %v1055_v42 = vadd.f32 %v1054_v53, %v411_v31  ;;  %2177 = vmatpush.bf16.msrb.mxu0 %v3677_v57  ;;  %v3676_v36 = vld [vmem:[%s4097_s5 + $0xb8] sm:$0xff]  ;;  %v3671_v53 = vld [vmem:[%s4097_s5 + $0x90] sm:$0xff] }
 0x140   :  { %2190 = vmatpush.bf16.msrb.mxu1 %v3685_v17  ;;  %2197 = vmatpush.bf16.msrb.mxu2 %v3699_v38 }
 0x141   :  { %v1068_v44 = vadd.f32 %v1067_v41, %v1055_v42  ;;  %v3698_v41 = vld [vmem:[%s4097_s5 + $0x168] sm:$0xff] }
 0x142   :  { %v3670_v42 = vld [vmem:[%s4097_s5 + $0x88] sm:$0xff] }
 0x143   :  { %2357 = vmatpush.bf16.msrb.mxu3 %v3656_v21  ;;  %v1028_v48 = vpop.f32.mrf.mxu2  ;;  %v1041_v49 = vpop.f32.mrf.mxu3  ;;  %2366 = vmatpush.bf16.msra.mxu0 %v3668_v58  ;;  %v3674_v21 = vld [vmem:[%s4097_s5 + $0xa8] sm:$0xff] }
 0x144   :  { %v1029_v50 = vadd.f32 %v1028_v48, %v1016_v18  ;;  %v1235_v18 = vperm.slane %v4025_v52, 0  ;;  %2379 = vmatpush.bf16.msra.mxu1 %v3676_v36  ;;  %2198 = vmatpush.bf16.msrb.mxu2 %v3698_v41 }
 0x146   :  { %v3979_v56 = vadd.f32 %v1041_v49, %v1029_v50  ;;  %v1056_v61 = vpop.f32.mrf.mxu0  ;;  %v1069_v62 = vpop.f32.mrf.mxu1  ;;  %v1236_v49 = vperm.slane %v4025_v52, 1 }
 0x147   :  { %2358 = vmatpush.bf16.msrb.mxu3 %v3655_v26  ;;  %2367 = vmatpush.bf16.msra.mxu0 %v3667_v63  ;;  %v3673_v26 = vld [vmem:[%s4097_s5 + $0xa0] sm:$0xff]  ;;  %v3694_v61 = vld [vmem:[%s4097_s5 + $0x148] sm:$0xff] }
 0x148   :  { %2380 = vmatpush.bf16.msra.mxu1 %v3675_v29  ;;  %2199 = vmatpush.bf16.msrb.mxu2 %v3697_v43  ;;  %v1098_v48 = vmax.f32 %v3979_v56, 0.0 }
 0x14a   :  { %v1101_v50 = vpack.c.bf16 %v1098_v48, %v1098_v48 }
 0x14b   :  { %2359 = vmatpush.bf16.msrb.mxu3 %v3654_v33  ;;  %v1030_v59 = vpop.f32.mrf.mxu2  ;;  %v1043_v60 = vpop.f32.mrf.mxu3  ;;  %2368 = vmatpush.bf16.msra.mxu0 %v3666_v3  ;;  %v3672_v33 = vld [vmem:[%s4097_s5 + $0x98] sm:$0xff] }
 0x14c   :  { %2381 = vmatpush.bf16.msra.mxu1 %v3674_v21  ;;  %2200 = vmatpush.bf16.msrb.mxu2 %v3696_v47  ;;  %v3693_v59 = vld [vmem:[%s4097_s5 + $0x140] sm:$0xff] }
 0x14f   :  { %2360 = vmatpush.bf16.msrb.mxu3 %v3653_v45  ;;  %2369 = vmatpush.bf16.msra.mxu0 %v3665_v39 }
 0x150   :  { %2382 = vmatpush.bf16.msra.mxu1 %v3673_v26  ;;  %2201 = vmatpush.bf16.msrb.mxu2 %v3695_v54 }
 0x152   :  { %2361 = vmatmul.bf16.vlgmr.msrb.gmra.mxu3 %v1100_v55 }
 0x153   :  { %2370 = vmatpush.bf16.msra.mxu0 %v3664_v8 }
 0x154   :  { %2383 = vmatpush.bf16.msra.mxu1 %v3672_v33  ;;  %2202 = vmatpush.bf16.msrb.mxu2 %v3694_v61 }
 0x157   :  { %v1080_v0 = vpop.f32.mrf.mxu2  ;;  %v1093_v1 = vpop.f32.mrf.mxu3  ;;  %2371 = vmatpush.bf16.msra.mxu0 %v3663_v13 }
 0x158   :  { %v1081_v4 = vadd.f32 %v1080_v0, %v1068_v44  ;;  %2384 = vmatpush.bf16.msra.mxu1 %v3671_v53  ;;  %2203 = vmatpush.bf16.msrb.mxu2 %v3693_v59 }
 0x15a   :  { %v3996_v5 = vadd.f32 %v1093_v1, %v1081_v4 }
 0x15b   :  { %2372 = vmatpush.bf16.msra.mxu0 %v3662_v15 }
 0x15c   :  { %2385 = vmatpush.bf16.msra.mxu1 %v3670_v42 }
 0x15e   :  { %v1776_v40 = vpop.f32.mrf.mxu0  ;;  %v1789_v7 = vpop.f32.mrf.mxu1 }
 0x15f   :  { %v1082_v12 = vpop.f32.mrf.mxu2  ;;  %v1095_v9 = vpop.f32.mrf.mxu3  ;;  %2373 = vmatpush.bf16.msra.mxu0 %v3661_v35  ;;  %v1777_v19 = vadd.f32 %v1776_v40, %v1235_v18  ;;  %v1099_v40 = vmax.f32 %v3996_v5, 0.0 }
 0x160   :  { %2386 = vmatpush.bf16.msra.mxu1 %v3669_v46 }
 0x161   :  { %v1790_v20 = vadd.f32 %v1789_v7, %v1777_v19  ;;  %v1237_v7 = vperm.slane %v4025_v52, 2  ;;  %v1102_v11 = vpack.c.bf16 %v1099_v40, %v1099_v40 }
 0x166   :  { %v1778_v51 = vpop.f32.mrf.mxu0  ;;  %v1791_v16 = vpop.f32.mrf.mxu1 }
 0x177   :  { %v1802_v22 = vpop.f32.mrf.mxu2  ;;  %v1815_v23 = vpop.f32.mrf.mxu3 }
 0x178   :  { %v1803_v24 = vadd.f32 %v1802_v22, %v1790_v20 }
 0x17a   :  { %v1816_v25 = vadd.f32 %v1815_v23, %v1803_v24 }
 0x17c   :  { %v1923_v28 = vmax.f32 %v1816_v25, 0.0 }
 0x17e   :  { %v1926_v30 = vpack.c.bf16 %v1923_v28, %v1923_v28  ;;  %v1828_v31 = vpop.f32.mrf.mxu0  ;;  %v1841_v32 = vpop.f32.mrf.mxu1  ;;  %v3704_v28 = vld [vmem:[%s4098_s6] ss:$0 sm:$0xff] }
 0x17f   :  { %v1804_v34 = vpop.f32.mrf.mxu2  ;;  %v1817_v37 = vpop.f32.mrf.mxu3  ;;  %v1829_v55 = vadd.f32 %v1828_v31, %v1236_v49 }
 0x180   :  { %2178 = vmatmul.bf16.vlgmr.msrb.gmra.mxu0 %v1926_v30 }
 0x181   :  { %v1842_v62 = vadd.f32 %v1841_v32, %v1829_v55 }
 0x186   :  { %v1830_v44 = vpop.f32.mrf.mxu0  ;;  %v1843_v45 = vpop.f32.mrf.mxu1 }
 0x190   :  { %2374 = vmatmul.bf16.vlgmr.msra.gmra.mxu0 %v1101_v50 }
 0x197   :  { %v1854_v57 = vpop.f32.mrf.mxu2  ;;  %v1867_v58 = vpop.f32.mrf.mxu3 }
 0x198   :  { %v1855_v56 = vadd.f32 %v1854_v57, %v1842_v62 }
 0x19a   :  { %v1868_v60 = vadd.f32 %v1867_v58, %v1855_v56 }
 0x19c   :  { %v1924_v63 = vmax.f32 %v1868_v60, 0.0 }
 0x19e   :  { %v1927_v0 = vpack.c.bf16 %v1924_v63, %v1924_v63  ;;  %v1880_v1 = vpop.f32.mrf.mxu0  ;;  %v1893_v2 = vpop.f32.mrf.mxu1 }
 0x19f   :  { %v1856_v3 = vpop.f32.mrf.mxu2  ;;  %v1869_v4 = vpop.f32.mrf.mxu3  ;;  %v1881_v8 = vadd.f32 %v1880_v1, %v1237_v7 }
 0x1a0   :  { %2191 = vmatmul.bf16.vlgmr.msrb.gmra.mxu1 %v1927_v0 }
 0x1a1   :  { %v1894_v12 = vadd.f32 %v1893_v2, %v1881_v8 }
 0x1a6   :  { %v1882_v6 = vpop.f32.mrf.mxu0  ;;  %v1895_v39 = vpop.f32.mrf.mxu1 }
 0x1b0   :  { %2387 = vmatmul.bf16.vlgmr.msra.gmra.mxu1 %v1102_v11 }
 0x1b5   :  { %v1906_v9 = vpop.f32.mrf.mxu2  ;;  %v1919_v10 = vpop.f32.mrf.mxu3 }
 0x1b6   :  { %v1907_v13 = vadd.f32 %v1906_v9, %v1894_v12 }
 0x1b8   :  { %v1920_v14 = vadd.f32 %v1919_v10, %v1907_v13 }
 0x1ba   :  { %v1925_v15 = vmax.f32 %v1920_v14, 0.0 }
 0x1bc   :  { %v1928_v51 = vpack.c.bf16 %v1925_v15, %v1925_v15 }
 0x1bd   :  { %v1908_v16 = vpop.f32.mrf.mxu2  ;;  %v1921_v17 = vpop.f32.mrf.mxu3 }
 0x1be   :  { %2204 = vmatmul.bf16.vlgmr.msrb.gmra.mxu2 %v1928_v51 }
 0x1d5   :  { %v2362_v35 = vpop.f32.mrf.mxu3 }
 0x1dd   :  { %v2364_v18 = vpop.f32.mrf.mxu3 }
 0x1fd   :  { %v2179_v36 = vpop.f32.mrf.mxu0 }
 0x205   :  { %v2181_v19 = vpop.f32.mrf.mxu0 }
 0x20d   :  { %v2375_v5 = vpop.f32.mrf.mxu0 }
 0x215   :  { %v2377_v29 = vpop.f32.mrf.mxu0 }
 0x21d   :  { %v2192_v52 = vpop.f32.mrf.mxu1 }
 0x21e   :  { %v2193_v23 = vadd.f32 %v2192_v52, %v2179_v36 }
 0x225   :  { %v2194_v20 = vpop.f32.mrf.mxu1 }
 0x22d   :  { %v2388_v21 = vpop.f32.mrf.mxu1 }
 0x235   :  { %v2390_v22 = vpop.f32.mrf.mxu1 }
 0x241   :  { %v2205_v24 = vpop.f32.mrf.mxu2 }
 0x242   :  { %v2206_v25 = vadd.f32 %v2205_v24, %v2193_v23 }
 0x244   :  { %v2363_v26 = vadd.f32 %v2362_v35, %v2206_v25 }
 0x246   :  { %v2376_v27 = vadd.f32 %v2375_v5, %v2363_v26 }
 0x248   :  { %v2389_v30 = vadd.f32 %v2388_v21, %v2376_v27 }
 0x249   :  { %v2207_v31 = vpop.f32.mrf.mxu2 }
 0x24a   :  { %v2396_v32 = vadd.f32 %v3704_v28, %v2389_v30 }
 0x24c   :  { %2398 = vst.msk [vmem:[%s4099_s7] sm:$0xff] %vm2397_vm2, %v2396_v32 }
 0x24d   :  { %2403 = vsyncpa [#allocation3], 1 }

</bundles_post_ra>
